<compile_context>
chip_gen: v6e
topology: v6e:2x2x1
jax: 0.10.0
libtpu: 0.0.40
codegen_flags: <defaults>
</compile_context>

<pallas_src>
import functools

import jax
import jax.numpy as jnp
from jax import lax
from jax.experimental import pallas as pl
from jax.experimental.pallas import tpu as pltpu


def _residual_kernel(K, P, EPS,
                     x_ref,
                     w1g_ref, g1g_ref, be1g_ref,
                     w2_ref, g2_ref, be2_ref,
                     out_ref):
    f32, bf16 = jnp.float32, jnp.bfloat16
    Bt, C_in, T = x_ref.shape
    C_out = w1g_ref.shape[1] // 2              # w1g is (K, 2*C_out, C_in)
    N = Bt * T

    # Channel-major activation block (C_in, Bt*T) as a VALUE (no im2col scratch).
    if Bt == 1:
        xtv = x_ref[0].astype(f32)
    else:
        xtv = jnp.concatenate([x_ref[b].astype(f32) for b in range(Bt)], axis=-1)

    # Hoisted per-column time-within-segment index; reused by every tap mask.
    t_seg = lax.broadcasted_iota(jnp.int32, (1, N), 1) % T

    def shifted_bf16(a, s):
        # a'[:, b*T + t] = a[:, b*T + t + s]  for 0 <= t+s < T, else 0.
        # roll handles the shift (XLU); the mask kills both the zero-padding
        # positions and any columns that wrapped across a batch seam.
        if s == 0:
            return a.astype(bf16)
        rolled = pltpu.roll(a, (-s) % N, 1)
        valid = jnp.logical_and(t_seg + s >= 0, t_seg + s < T)
        return jnp.where(valid, rolled, 0.0).astype(bf16)

    def conv(w_ref, a):
        # sum_k  W_k (O, C) @ shift_k(a) (C, N), bf16 operands, f32 accumulation.
        acc = jnp.dot(w_ref[0], shifted_bf16(a, -P), preferred_element_type=f32)
        for k in range(1, K):
            acc = acc + jnp.dot(w_ref[k], shifted_bf16(a, k - P),
                                preferred_element_type=f32)
        return acc                                               # (O, N) f32

    def inorm(h_flat, g_ref, be_ref):
        C = h_flat.shape[0]
        h = h_flat.reshape(C, Bt, T)                             # per-(channel, b) stats
        mean = jnp.mean(h, axis=-1, keepdims=True)
        d = h - mean
        var = jnp.mean(d * d, axis=-1, keepdims=True)            # two-pass, biased
        return (d * lax.rsqrt(var + EPS) * g_ref[...].reshape(C, 1, 1)
                + be_ref[...].reshape(C, 1, 1))                  # (C, Bt, T)

    # ---- stage 1: fused conv1 + conv_gates (biases dropped: cancel in InstanceNorm)
    h12 = conv(w1g_ref, xtv)                                     # (2*C_out, N)
    hn1 = inorm(h12, g1g_ref, be1g_ref)                          # (2*C_out, Bt, T)
    glu = hn1[:C_out] * jax.nn.sigmoid(hn1[C_out:])              # (C_out, Bt, T)

    # ---- stage 2: conv2 + InstanceNorm
    h2 = conv(w2_ref, glu.reshape(C_out, N))                     # (C_in, N)
    hn2 = inorm(h2, g2_ref, be2_ref)                             # (C_in, Bt, T)

    # ---- residual add; x is only read here (no long-lived f32 input copy)
    for b in range(Bt):
        out_ref[b] = (x_ref[b].astype(f32) + hn2[:, b, :]).astype(out_ref.dtype)


def _vmem_capacity_bytes():
    try:
        cap = int(getattr(pltpu.get_tpu_info(), "vmem_capacity_bytes"))
        if cap > 0:
            return cap
    except Exception:
        pass
    return 64 * 1024 * 1024          # v7x per-core size; safe lower bound


def _pick_tiles(B, C_in, C_out, T, K, x_itemsize):
    """Pick the batch block Bt and a generation-aware VMEM limit."""
    capacity = _vmem_capacity_bytes()
    budget = capacity * 3 // 4        # ~48 MiB on v7x, ~96 MiB on v5e/v6e

    def est_bytes(bt):
        n = bt * T
        w_bytes = (K * 2 * C_out * C_in + K * C_in * C_out) * 2       # bf16 weights
        vec_bytes = (2 * (2 * C_out) + 2 * C_in) * 4                  # affine vectors
        b = 0
        b += 2 * 2 * bt * C_in * T * x_itemsize        # x in + out blocks, double-buffered
        b += 2 * (w_bytes + vec_bytes)                 # constant operands, double-buffered
        b += C_in * n * 4                              # channel-major activation value
        b += 2 * (2 * C_out) * n * 4                   # h12 + centered/normalized temp
        b += C_out * n * 4                             # glu
        b += 2 * C_in * n * 4                          # h2 + normalized temp
        b += 2 * max(C_in, C_out) * n * 4              # rolled tap operands in flight
        b += (2 * C_out) * n * 2                       # bf16 copies fed to the MXU
        return b

    best = 1
    for cand in range(1, B + 1):
        if B % cand:
            continue
        if B >= 2 and B // cand < 2:   # keep >=2 grid steps so v7x can use both TCs
            break
        if cand * T > 4096:            # enough lane columns; don't burn VMEM past this
            break
        if est_bytes(cand) > budget:
            break
        best = cand

    vmem_limit = int(max(budget, 32 * 1024 * 1024))
    return best, vmem_limit


def _col(*vs):
    return jnp.concatenate([v.reshape(-1) for v in vs]).reshape(-1, 1).astype(jnp.float32)


def residual_layer_1d(x, params, *, kernel_size, stride, padding):
    # The residual connection requires T_out == T (stride=1, 2*padding == K-1).
    assert stride == 1 and 2 * padding == kernel_size - 1
    B, C_in, T = x.shape
    C_out = params["w1"].shape[0]
    K, P = kernel_size, padding

    Bt, vmem_limit = _pick_tiles(B, C_in, C_out, T, K, jnp.dtype(x.dtype).itemsize)
    grid = (B // Bt,)

    # Host-side parameter prep (tiny): fuse conv1 + conv_gates, per-tap weight
    # layout (K, O, I), bf16 MXU operands.  Conv biases are dropped entirely —
    # a per-channel constant added before InstanceNorm cancels exactly.
    w1g = jnp.concatenate([params["w1"], params["wg"]], axis=0)          # (2*C_out, C_in, K)
    w1g_k = jnp.transpose(w1g, (2, 0, 1)).astype(jnp.bfloat16)           # (K, 2*C_out, C_in)
    w2_k = jnp.transpose(params["w2"], (2, 0, 1)).astype(jnp.bfloat16)   # (K, C_in, C_out)

    g1g = _col(params["g1"], params["gg"])
    be1g = _col(params["be1"], params["beg"])
    g2c = _col(params["g2"])
    be2c = _col(params["be2"])

    def const_spec(shape):
        return pl.BlockSpec(shape, lambda i: (0,) * len(shape))

    kern = functools.partial(_residual_kernel, K, P, 1e-5)

    return pl.pallas_call(
        kern,
        out_shape=jax.ShapeDtypeStruct((B, C_in, T), x.dtype),
        grid_spec=pltpu.PrefetchScalarGridSpec(
            num_scalar_prefetch=0,
            grid=grid,
            in_specs=[
                pl.BlockSpec((Bt, C_in, T), lambda i: (i, 0, 0)),
                const_spec((K, 2 * C_out, C_in)),
                const_spec((2 * C_out, 1)),
                const_spec((2 * C_out, 1)),
                const_spec((K, C_in, C_out)),
                const_spec((C_in, 1)),
                const_spec((C_in, 1)),
            ],
            out_specs=pl.BlockSpec((Bt, C_in, T), lambda i: (i, 0, 0)),
        ),
        compiler_params=pltpu.CompilerParams(
            dimension_semantics=("parallel",),
            vmem_limit_bytes=vmem_limit,
        ),
    )(x, w1g_k, g1g, be1g, w2_k, g2c, be2c)


# ---------------- pure-JAX reference (for correctness check) ----------------
def _conv1d_ref(x, w, b, padding):
    y = lax.conv_general_dilated(
        x, w, window_strides=(1,), padding=[(padding, padding)],
        dimension_numbers=("NCH", "OIH", "NCH"))
    return y + b.reshape(1, -1, 1)


def _inorm_ref(h, g, be, eps=1e-5):
    mean = jnp.mean(h, axis=-1, keepdims=True)
    var = jnp.mean((h - mean) ** 2, axis=-1, keepdims=True)
    return (h - mean) * lax.rsqrt(var + eps) * g.reshape(1, -1, 1) + be.reshape(1, -1, 1)


def residual_layer_1d_ref(x, p, *, padding):
    h1 = _inorm_ref(_conv1d_ref(x, p["w1"], p["b1"], padding), p["g1"], p["be1"])
    hg = _inorm_ref(_conv1d_ref(x, p["wg"], p["bg"], padding), p["gg"], p["beg"])
    hglu = h1 * jax.nn.sigmoid(hg)
    h2 = _inorm_ref(_conv1d_ref(hglu, p["w2"], p["b2"], padding), p["g2"], p["be2"])
    return x + h2


if __name__ == "__main__":
    B, C_in, C_out, T = 2, 4, 8, 16
    K, S, P = 3, 1, 1

    key = jax.random.PRNGKey(0)
    keys = jax.random.split(key, 16)
    params = {
        "w1": jax.random.normal(keys[0], (C_out, C_in, K), jnp.float32) * 0.2,
        "b1": jax.random.normal(keys[1], (C_out,), jnp.float32) * 0.1,
        "g1": 1.0 + 0.1 * jax.random.normal(keys[2], (C_out,), jnp.float32),
        "be1": 0.1 * jax.random.normal(keys[3], (C_out,), jnp.float32),
        "wg": jax.random.normal(keys[4], (C_out, C_in, K), jnp.float32) * 0.2,
        "bg": jax.random.normal(keys[5], (C_out,), jnp.float32) * 0.1,
        "gg": 1.0 + 0.1 * jax.random.normal(keys[6], (C_out,), jnp.float32),
        "beg": 0.1 * jax.random.normal(keys[7], (C_out,), jnp.float32),
        "w2": jax.random.normal(keys[8], (C_in, C_out, K), jnp.float32) * 0.2,
        "b2": jax.random.normal(keys[9], (C_in,), jnp.float32) * 0.1,
        "g2": 1.0 + 0.1 * jax.random.normal(keys[10], (C_in,), jnp.float32),
        "be2": 0.1 * jax.random.normal(keys[11], (C_in,), jnp.float32),
    }
    x = jax.random.normal(keys[12], (B, C_in, T), jnp.float32)

    out = residual_layer_1d(x, params, kernel_size=K, stride=S, padding=P)
    out = jax.block_until_ready(out)

    ref = residual_layer_1d_ref(x, params, padding=P)
    assert out.shape == (B, C_in, T)
    # bf16 MXU operands (f32 accumulation) relax parity with the f32 reference
    # to the ~1e-2 level; structural errors would show up as O(1) mismatches.
    err = float(jnp.max(jnp.abs(out - ref)))
    assert jnp.allclose(out, ref, atol=5e-2, rtol=5e-2), err

    print("KERNEL_OK")
</pallas_src>

<mosaic_0001>
module attributes {stable_mosaic.version = 11 : i64} {
  func.func @_residual_kernel(%arg0: i32, %arg1: memref<1x4x16xf32, #tpu.memory_space<vmem>>, %arg2: memref<3x16x4xbf16, #tpu.memory_space<vmem>>, %arg3: memref<16x1xf32, #tpu.memory_space<vmem>>, %arg4: memref<16x1xf32, #tpu.memory_space<vmem>>, %arg5: memref<3x4x8xbf16, #tpu.memory_space<vmem>>, %arg6: memref<4x1xf32, #tpu.memory_space<vmem>>, %arg7: memref<4x1xf32, #tpu.memory_space<vmem>>, %arg8: memref<1x4x16xf32, #tpu.memory_space<vmem>>) attributes {dimension_semantics = [#tpu.dimension_semantics<parallel>], iteration_bounds = array<i64: 2>, scalar_prefetch = 0 : i64, scratch_operands = 0 : i64, tpu.core_type = #tpu.core_type<tc>, window_params = [{transform_indices = @transform_0, window_bounds = array<i64: 1, 4, 16>}, {pipeline_mode = #tpu.pipeline_mode<synchronous>, transform_indices = @transform_1, window_bounds = array<i64: 3, 16, 4>}, {pipeline_mode = #tpu.pipeline_mode<synchronous>, transform_indices = @transform_2, window_bounds = array<i64: 16, 1>}, {pipeline_mode = #tpu.pipeline_mode<synchronous>, transform_indices = @transform_3, window_bounds = array<i64: 16, 1>}, {pipeline_mode = #tpu.pipeline_mode<synchronous>, transform_indices = @transform_4, window_bounds = array<i64: 3, 4, 8>}, {pipeline_mode = #tpu.pipeline_mode<synchronous>, transform_indices = @transform_5, window_bounds = array<i64: 4, 1>}, {pipeline_mode = #tpu.pipeline_mode<synchronous>, transform_indices = @transform_6, window_bounds = array<i64: 4, 1>}, {transform_indices = @transform_7, window_bounds = array<i64: 1, 4, 16>}]} {
    %c0 = arith.constant 0 : index
    %c0_0 = arith.constant 0 : index
    %c0_1 = arith.constant 0 : index
    %0 = vector.load %arg1[%c0, %c0_0, %c0_1] : memref<1x4x16xf32, #tpu.memory_space<vmem>>, vector<1x4x16xf32>
    %1 = vector.shape_cast %0 : vector<1x4x16xf32> to vector<4x16xf32>
    %2 = tpu.iota {dimensions = array<i32: 1>} : vector<1x16xi32>
    %c16_i32 = arith.constant 16 : i32
    %c0_i32 = arith.constant 0 : i32
    %3 = arith.cmpi eq, %c16_i32, %c0_i32 : i32
    %c1_i32 = arith.constant 1 : i32
    %4 = arith.select %3, %c1_i32, %c16_i32 : i32
    %5 = vector.broadcast %4 : i32 to vector<1x16xi32>
    %6 = arith.remsi %2, %5 : vector<1x16xi32>
    %c0_i32_2 = arith.constant 0 : i32
    %7 = vector.broadcast %c0_i32_2 : i32 to vector<1x16xi32>
    %8 = arith.cmpi ne, %6, %7 : vector<1x16xi32>
    %c0_i32_3 = arith.constant 0 : i32
    %9 = vector.broadcast %c0_i32_3 : i32 to vector<1x16xi32>
    %10 = arith.cmpi slt, %6, %9 : vector<1x16xi32>
    %c0_i32_4 = arith.constant 0 : i32
    %11 = arith.cmpi slt, %4, %c0_i32_4 : i32
    %12 = vector.broadcast %11 : i1 to vector<1x16xi1>
    %13 = vector.broadcast %12 : vector<1x16xi1> to vector<1x16xi1>
    %14 = arith.xori %10, %13 : vector<1x16xi1>
    %15 = arith.andi %14, %8 : vector<1x16xi1>
    %16 = vector.broadcast %4 : i32 to vector<1x16xi32>
    %17 = arith.addi %6, %16 : vector<1x16xi32>
    %18 = arith.select %15, %17, %6 : vector<1x16xi1>, vector<1x16xi32>
    %c0_5 = arith.constant 0 : index
    %c0_6 = arith.constant 0 : index
    %c0_7 = arith.constant 0 : index
    %19 = vector.load %arg2[%c0_5, %c0_6, %c0_7] : memref<3x16x4xbf16, #tpu.memory_space<vmem>>, vector<1x16x4xbf16>
    %20 = vector.shape_cast %19 : vector<1x16x4xbf16> to vector<16x4xbf16>
    %c1_i32_8 = arith.constant 1 : i32
    %21 = tpu.dynamic_rotate %1 by %c1_i32_8 dim 1 : vector<4x16xf32>, i32 -> vector<4x16xf32>
    %c-1_i32 = arith.constant -1 : i32
    %22 = vector.broadcast %c-1_i32 : i32 to vector<1x16xi32>
    %23 = arith.addi %18, %22 : vector<1x16xi32>
    %c0_i32_9 = arith.constant 0 : i32
    %24 = vector.broadcast %c0_i32_9 : i32 to vector<1x16xi32>
    %25 = arith.cmpi sge, %23, %24 : vector<1x16xi32>
    %c-1_i32_10 = arith.constant -1 : i32
    %26 = vector.broadcast %c-1_i32_10 : i32 to vector<1x16xi32>
    %27 = arith.addi %18, %26 : vector<1x16xi32>
    %c16_i32_11 = arith.constant 16 : i32
    %28 = vector.broadcast %c16_i32_11 : i32 to vector<1x16xi32>
    %29 = arith.cmpi slt, %27, %28 : vector<1x16xi32>
    %30 = arith.andi %25, %29 : vector<1x16xi1>
    %cst = arith.constant 0.000000e+00 : f32
    %31 = vector.shape_cast %30 : vector<1x16xi1> to vector<1x16xi1>
    %32 = vector.broadcast %31 : vector<1x16xi1> to vector<4x16xi1>
    %33 = vector.broadcast %cst : f32 to vector<4x16xf32>
    %34 = arith.select %32, %21, %33 : vector<4x16xi1>, vector<4x16xf32>
    %35 = arith.truncf %34 : vector<4x16xf32> to vector<4x16xbf16>
    %cst_12 = arith.constant dense<0.000000e+00> : vector<16x16xf32>
    %36 = tpu.matmul %20, %35, %cst_12 {dimension_numbers = #tpu.dot_dimension_numbers<[1], [0], [0], [1], [0, 0, 1, 1], [], []>} : vector<16x4xbf16>, vector<4x16xbf16>, vector<16x16xf32> -> vector<16x16xf32>
    %c1 = arith.constant 1 : index
    %c0_13 = arith.constant 0 : index
    %c0_14 = arith.constant 0 : index
    %37 = vector.load %arg2[%c1, %c0_13, %c0_14] : memref<3x16x4xbf16, #tpu.memory_space<vmem>>, vector<1x16x4xbf16>
    %38 = vector.shape_cast %37 : vector<1x16x4xbf16> to vector<16x4xbf16>
    %39 = arith.truncf %1 : vector<4x16xf32> to vector<4x16xbf16>
    %cst_15 = arith.constant dense<0.000000e+00> : vector<16x16xf32>
    %40 = tpu.matmul %38, %39, %cst_15 {dimension_numbers = #tpu.dot_dimension_numbers<[1], [0], [0], [1], [0, 0, 1, 1], [], []>} : vector<16x4xbf16>, vector<4x16xbf16>, vector<16x16xf32> -> vector<16x16xf32>
    %41 = arith.addf %36, %40 : vector<16x16xf32>
    %c2 = arith.constant 2 : index
    %c0_16 = arith.constant 0 : index
    %c0_17 = arith.constant 0 : index
    %42 = vector.load %arg2[%c2, %c0_16, %c0_17] : memref<3x16x4xbf16, #tpu.memory_space<vmem>>, vector<1x16x4xbf16>
    %43 = vector.shape_cast %42 : vector<1x16x4xbf16> to vector<16x4xbf16>
    %c15_i32 = arith.constant 15 : i32
    %44 = tpu.dynamic_rotate %1 by %c15_i32 dim 1 : vector<4x16xf32>, i32 -> vector<4x16xf32>
    %c1_i32_18 = arith.constant 1 : i32
    %45 = vector.broadcast %c1_i32_18 : i32 to vector<1x16xi32>
    %46 = arith.addi %18, %45 : vector<1x16xi32>
    %c0_i32_19 = arith.constant 0 : i32
    %47 = vector.broadcast %c0_i32_19 : i32 to vector<1x16xi32>
    %48 = arith.cmpi sge, %46, %47 : vector<1x16xi32>
    %c1_i32_20 = arith.constant 1 : i32
    %49 = vector.broadcast %c1_i32_20 : i32 to vector<1x16xi32>
    %50 = arith.addi %18, %49 : vector<1x16xi32>
    %c16_i32_21 = arith.constant 16 : i32
    %51 = vector.broadcast %c16_i32_21 : i32 to vector<1x16xi32>
    %52 = arith.cmpi slt, %50, %51 : vector<1x16xi32>
    %53 = arith.andi %48, %52 : vector<1x16xi1>
    %cst_22 = arith.constant 0.000000e+00 : f32
    %54 = vector.shape_cast %53 : vector<1x16xi1> to vector<1x16xi1>
    %55 = vector.broadcast %54 : vector<1x16xi1> to vector<4x16xi1>
    %56 = vector.broadcast %cst_22 : f32 to vector<4x16xf32>
    %57 = arith.select %55, %44, %56 : vector<4x16xi1>, vector<4x16xf32>
    %58 = arith.truncf %57 : vector<4x16xf32> to vector<4x16xbf16>
    %cst_23 = arith.constant dense<0.000000e+00> : vector<16x16xf32>
    %59 = tpu.matmul %43, %58, %cst_23 {dimension_numbers = #tpu.dot_dimension_numbers<[1], [0], [0], [1], [0, 0, 1, 1], [], []>} : vector<16x4xbf16>, vector<4x16xbf16>, vector<16x16xf32> -> vector<16x16xf32>
    %60 = arith.addf %41, %59 : vector<16x16xf32>
    %61 = vector.shape_cast %60 : vector<16x16xf32> to vector<16x1x16xf32>
    %cst_24 = arith.constant dense<0.000000e+00> : vector<16x1xf32>
    %62 = vector.multi_reduction <add>, %61, %cst_24 [2] : vector<16x1x16xf32> to vector<16x1xf32>
    %63 = vector.shape_cast %62 : vector<16x1xf32> to vector<16x1x1xf32>
    %cst_25 = arith.constant 1.600000e+01 : f32
    %64 = vector.broadcast %cst_25 : f32 to vector<16x1x1xf32>
    %65 = arith.divf %63, %64 : vector<16x1x1xf32>
    %66 = vector.broadcast %65 : vector<16x1x1xf32> to vector<16x1x16xf32>
    %67 = arith.subf %61, %66 : vector<16x1x16xf32>
    %68 = arith.mulf %67, %67 : vector<16x1x16xf32>
    %cst_26 = arith.constant dense<0.000000e+00> : vector<16x1xf32>
    %69 = vector.multi_reduction <add>, %68, %cst_26 [2] : vector<16x1x16xf32> to vector<16x1xf32>
    %70 = vector.shape_cast %69 : vector<16x1xf32> to vector<16x1x1xf32>
    %cst_27 = arith.constant 1.600000e+01 : f32
    %71 = vector.broadcast %cst_27 : f32 to vector<16x1x1xf32>
    %72 = arith.divf %70, %71 : vector<16x1x1xf32>
    %cst_28 = arith.constant 9.99999974E-6 : f32
    %73 = vector.broadcast %cst_28 : f32 to vector<16x1x1xf32>
    %74 = arith.addf %72, %73 : vector<16x1x1xf32>
    %75 = math.rsqrt %74 : vector<16x1x1xf32>
    %76 = vector.broadcast %75 : vector<16x1x1xf32> to vector<16x1x16xf32>
    %77 = arith.mulf %67, %76 : vector<16x1x16xf32>
    %c0_29 = arith.constant 0 : index
    %c0_30 = arith.constant 0 : index
    %78 = vector.load %arg3[%c0_29, %c0_30] : memref<16x1xf32, #tpu.memory_space<vmem>>, vector<16x1xf32>
    %79 = vector.shape_cast %78 : vector<16x1xf32> to vector<16x1x1xf32>
    %80 = vector.broadcast %79 : vector<16x1x1xf32> to vector<16x1x16xf32>
    %81 = arith.mulf %77, %80 : vector<16x1x16xf32>
    %c0_31 = arith.constant 0 : index
    %c0_32 = arith.constant 0 : index
    %82 = vector.load %arg4[%c0_31, %c0_32] : memref<16x1xf32, #tpu.memory_space<vmem>>, vector<16x1xf32>
    %83 = vector.shape_cast %82 : vector<16x1xf32> to vector<16x1x1xf32>
    %84 = vector.broadcast %83 : vector<16x1x1xf32> to vector<16x1x16xf32>
    %85 = arith.addf %81, %84 : vector<16x1x16xf32>
    %86 = vector.extract_strided_slice %85 {offsets = [0, 0, 0], sizes = [8, 1, 16], strides = [1, 1, 1]} : vector<16x1x16xf32> to vector<8x1x16xf32>
    %87 = vector.extract_strided_slice %85 {offsets = [8, 0, 0], sizes = [8, 1, 16], strides = [1, 1, 1]} : vector<16x1x16xf32> to vector<8x1x16xf32>
    %88 = arith.negf %87 : vector<8x1x16xf32>
    %89 = math.exp %88 : vector<8x1x16xf32>
    %cst_33 = arith.constant 1.000000e+00 : f32
    %90 = vector.broadcast %cst_33 : f32 to vector<8x1x16xf32>
    %91 = arith.addf %90, %89 : vector<8x1x16xf32>
    %92 = arith.divf %90, %91 : vector<8x1x16xf32>
    %93 = arith.mulf %86, %92 : vector<8x1x16xf32>
    %94 = vector.shape_cast %93 : vector<8x1x16xf32> to vector<8x16xf32>
    %c0_34 = arith.constant 0 : index
    %c0_35 = arith.constant 0 : index
    %c0_36 = arith.constant 0 : index
    %95 = vector.load %arg5[%c0_34, %c0_35, %c0_36] : memref<3x4x8xbf16, #tpu.memory_space<vmem>>, vector<1x4x8xbf16>
    %96 = vector.shape_cast %95 : vector<1x4x8xbf16> to vector<4x8xbf16>
    %c1_i32_37 = arith.constant 1 : i32
    %97 = tpu.dynamic_rotate %94 by %c1_i32_37 dim 1 : vector<8x16xf32>, i32 -> vector<8x16xf32>
    %c-1_i32_38 = arith.constant -1 : i32
    %98 = vector.broadcast %c-1_i32_38 : i32 to vector<1x16xi32>
    %99 = arith.addi %18, %98 : vector<1x16xi32>
    %c0_i32_39 = arith.constant 0 : i32
    %100 = vector.broadcast %c0_i32_39 : i32 to vector<1x16xi32>
    %101 = arith.cmpi sge, %99, %100 : vector<1x16xi32>
    %c-1_i32_40 = arith.constant -1 : i32
    %102 = vector.broadcast %c-1_i32_40 : i32 to vector<1x16xi32>
    %103 = arith.addi %18, %102 : vector<1x16xi32>
    %c16_i32_41 = arith.constant 16 : i32
    %104 = vector.broadcast %c16_i32_41 : i32 to vector<1x16xi32>
    %105 = arith.cmpi slt, %103, %104 : vector<1x16xi32>
    %106 = arith.andi %101, %105 : vector<1x16xi1>
    %cst_42 = arith.constant 0.000000e+00 : f32
    %107 = vector.shape_cast %106 : vector<1x16xi1> to vector<1x16xi1>
    %108 = vector.broadcast %107 : vector<1x16xi1> to vector<8x16xi1>
    %109 = vector.broadcast %cst_42 : f32 to vector<8x16xf32>
    %110 = arith.select %108, %97, %109 : vector<8x16xi1>, vector<8x16xf32>
    %111 = arith.truncf %110 : vector<8x16xf32> to vector<8x16xbf16>
    %cst_43 = arith.constant dense<0.000000e+00> : vector<4x16xf32>
    %112 = tpu.matmul %96, %111, %cst_43 {dimension_numbers = #tpu.dot_dimension_numbers<[1], [0], [0], [1], [0, 0, 1, 1], [], []>} : vector<4x8xbf16>, vector<8x16xbf16>, vector<4x16xf32> -> vector<4x16xf32>
    %c1_44 = arith.constant 1 : index
    %c0_45 = arith.constant 0 : index
    %c0_46 = arith.constant 0 : index
    %113 = vector.load %arg5[%c1_44, %c0_45, %c0_46] : memref<3x4x8xbf16, #tpu.memory_space<vmem>>, vector<1x4x8xbf16>
    %114 = vector.shape_cast %113 : vector<1x4x8xbf16> to vector<4x8xbf16>
    %115 = arith.truncf %94 : vector<8x16xf32> to vector<8x16xbf16>
    %cst_47 = arith.constant dense<0.000000e+00> : vector<4x16xf32>
    %116 = tpu.matmul %114, %115, %cst_47 {dimension_numbers = #tpu.dot_dimension_numbers<[1], [0], [0], [1], [0, 0, 1, 1], [], []>} : vector<4x8xbf16>, vector<8x16xbf16>, vector<4x16xf32> -> vector<4x16xf32>
    %117 = arith.addf %112, %116 : vector<4x16xf32>
    %c2_48 = arith.constant 2 : index
    %c0_49 = arith.constant 0 : index
    %c0_50 = arith.constant 0 : index
    %118 = vector.load %arg5[%c2_48, %c0_49, %c0_50] : memref<3x4x8xbf16, #tpu.memory_space<vmem>>, vector<1x4x8xbf16>
    %119 = vector.shape_cast %118 : vector<1x4x8xbf16> to vector<4x8xbf16>
    %c15_i32_51 = arith.constant 15 : i32
    %120 = tpu.dynamic_rotate %94 by %c15_i32_51 dim 1 : vector<8x16xf32>, i32 -> vector<8x16xf32>
    %c1_i32_52 = arith.constant 1 : i32
    %121 = vector.broadcast %c1_i32_52 : i32 to vector<1x16xi32>
    %122 = arith.addi %18, %121 : vector<1x16xi32>
    %c0_i32_53 = arith.constant 0 : i32
    %123 = vector.broadcast %c0_i32_53 : i32 to vector<1x16xi32>
    %124 = arith.cmpi sge, %122, %123 : vector<1x16xi32>
    %c1_i32_54 = arith.constant 1 : i32
    %125 = vector.broadcast %c1_i32_54 : i32 to vector<1x16xi32>
    %126 = arith.addi %18, %125 : vector<1x16xi32>
    %c16_i32_55 = arith.constant 16 : i32
    %127 = vector.broadcast %c16_i32_55 : i32 to vector<1x16xi32>
    %128 = arith.cmpi slt, %126, %127 : vector<1x16xi32>
    %129 = arith.andi %124, %128 : vector<1x16xi1>
    %cst_56 = arith.constant 0.000000e+00 : f32
    %130 = vector.shape_cast %129 : vector<1x16xi1> to vector<1x16xi1>
    %131 = vector.broadcast %130 : vector<1x16xi1> to vector<8x16xi1>
    %132 = vector.broadcast %cst_56 : f32 to vector<8x16xf32>
    %133 = arith.select %131, %120, %132 : vector<8x16xi1>, vector<8x16xf32>
    %134 = arith.truncf %133 : vector<8x16xf32> to vector<8x16xbf16>
    %cst_57 = arith.constant dense<0.000000e+00> : vector<4x16xf32>
    %135 = tpu.matmul %119, %134, %cst_57 {dimension_numbers = #tpu.dot_dimension_numbers<[1], [0], [0], [1], [0, 0, 1, 1], [], []>} : vector<4x8xbf16>, vector<8x16xbf16>, vector<4x16xf32> -> vector<4x16xf32>
    %136 = arith.addf %117, %135 : vector<4x16xf32>
    %137 = vector.shape_cast %136 : vector<4x16xf32> to vector<4x1x16xf32>
    %cst_58 = arith.constant dense<0.000000e+00> : vector<4x1xf32>
    %138 = vector.multi_reduction <add>, %137, %cst_58 [2] : vector<4x1x16xf32> to vector<4x1xf32>
    %139 = vector.shape_cast %138 : vector<4x1xf32> to vector<4x1x1xf32>
    %cst_59 = arith.constant 1.600000e+01 : f32
    %140 = vector.broadcast %cst_59 : f32 to vector<4x1x1xf32>
    %141 = arith.divf %139, %140 : vector<4x1x1xf32>
    %142 = vector.broadcast %141 : vector<4x1x1xf32> to vector<4x1x16xf32>
    %143 = arith.subf %137, %142 : vector<4x1x16xf32>
    %144 = arith.mulf %143, %143 : vector<4x1x16xf32>
    %cst_60 = arith.constant dense<0.000000e+00> : vector<4x1xf32>
    %145 = vector.multi_reduction <add>, %144, %cst_60 [2] : vector<4x1x16xf32> to vector<4x1xf32>
    %146 = vector.shape_cast %145 : vector<4x1xf32> to vector<4x1x1xf32>
    %cst_61 = arith.constant 1.600000e+01 : f32
    %147 = vector.broadcast %cst_61 : f32 to vector<4x1x1xf32>
    %148 = arith.divf %146, %147 : vector<4x1x1xf32>
    %cst_62 = arith.constant 9.99999974E-6 : f32
    %149 = vector.broadcast %cst_62 : f32 to vector<4x1x1xf32>
    %150 = arith.addf %148, %149 : vector<4x1x1xf32>
    %151 = math.rsqrt %150 : vector<4x1x1xf32>
    %152 = vector.broadcast %151 : vector<4x1x1xf32> to vector<4x1x16xf32>
    %153 = arith.mulf %143, %152 : vector<4x1x16xf32>
    %c0_63 = arith.constant 0 : index
    %c0_64 = arith.constant 0 : index
    %154 = vector.load %arg6[%c0_63, %c0_64] : memref<4x1xf32, #tpu.memory_space<vmem>>, vector<4x1xf32>
    %155 = vector.shape_cast %154 : vector<4x1xf32> to vector<4x1x1xf32>
    %156 = vector.broadcast %155 : vector<4x1x1xf32> to vector<4x1x16xf32>
    %157 = arith.mulf %153, %156 : vector<4x1x16xf32>
    %c0_65 = arith.constant 0 : index
    %c0_66 = arith.constant 0 : index
    %158 = vector.load %arg7[%c0_65, %c0_66] : memref<4x1xf32, #tpu.memory_space<vmem>>, vector<4x1xf32>
    %159 = vector.shape_cast %158 : vector<4x1xf32> to vector<4x1x1xf32>
    %160 = vector.broadcast %159 : vector<4x1x1xf32> to vector<4x1x16xf32>
    %161 = arith.addf %157, %160 : vector<4x1x16xf32>
    %c0_67 = arith.constant 0 : index
    %c0_68 = arith.constant 0 : index
    %c0_69 = arith.constant 0 : index
    %162 = vector.load %arg1[%c0_67, %c0_68, %c0_69] : memref<1x4x16xf32, #tpu.memory_space<vmem>>, vector<1x4x16xf32>
    %163 = vector.shape_cast %162 : vector<1x4x16xf32> to vector<4x16xf32>
    %164 = vector.shape_cast %161 : vector<4x1x16xf32> to vector<4x16xf32>
    %165 = arith.addf %163, %164 : vector<4x16xf32>
    %c0_70 = arith.constant 0 : index
    %c0_71 = arith.constant 0 : index
    %c0_72 = arith.constant 0 : index
    %166 = vector.load %arg8[%c0_70, %c0_71, %c0_72] : memref<1x4x16xf32, #tpu.memory_space<vmem>>, vector<1x4x16xf32>
    %167 = vector.shape_cast %166 : vector<1x4x16xf32> to vector<4x16xf32>
    %168 = vector.shape_cast %165 : vector<4x16xf32> to vector<1x4x16xf32>
    tpu.vector_store %arg8[%c0_70, %c0_71, %c0_72], %168 {strides = array<i32>} : memref<1x4x16xf32, #tpu.memory_space<vmem>>, vector<1x4x16xf32>,
    return
  }
  func.func @transform_0(%arg0: i32) -> (i32, i32, i32) {
    %c0_i32 = arith.constant 0 : i32
    %c0_i32_0 = arith.constant 0 : i32
    %c0_i32_1 = arith.constant 0 : i32
    return %arg0, %c0_i32, %c0_i32_0 : i32, i32, i32
  }
  func.func @transform_1(%arg0: i32) -> (i32, i32, i32) {
    %c0_i32 = arith.constant 0 : i32
    %c0_i32_0 = arith.constant 0 : i32
    %c0_i32_1 = arith.constant 0 : i32
    %c0_i32_2 = arith.constant 0 : i32
    return %c0_i32, %c0_i32_0, %c0_i32_1 : i32, i32, i32
  }
  func.func @transform_2(%arg0: i32) -> (i32, i32) {
    %c0_i32 = arith.constant 0 : i32
    %c0_i32_0 = arith.constant 0 : i32
    %c0_i32_1 = arith.constant 0 : i32
    return %c0_i32, %c0_i32_0 : i32, i32
  }
  func.func @transform_3(%arg0: i32) -> (i32, i32) {
    %c0_i32 = arith.constant 0 : i32
    %c0_i32_0 = arith.constant 0 : i32
    %c0_i32_1 = arith.constant 0 : i32
    return %c0_i32, %c0_i32_0 : i32, i32
  }
  func.func @transform_4(%arg0: i32) -> (i32, i32, i32) {
    %c0_i32 = arith.constant 0 : i32
    %c0_i32_0 = arith.constant 0 : i32
    %c0_i32_1 = arith.constant 0 : i32
    %c0_i32_2 = arith.constant 0 : i32
    return %c0_i32, %c0_i32_0, %c0_i32_1 : i32, i32, i32
  }
  func.func @transform_5(%arg0: i32) -> (i32, i32) {
    %c0_i32 = arith.constant 0 : i32
    %c0_i32_0 = arith.constant 0 : i32
    %c0_i32_1 = arith.constant 0 : i32
    return %c0_i32, %c0_i32_0 : i32, i32
  }
  func.func @transform_6(%arg0: i32) -> (i32, i32) {
    %c0_i32 = arith.constant 0 : i32
    %c0_i32_0 = arith.constant 0 : i32
    %c0_i32_1 = arith.constant 0 : i32
    return %c0_i32, %c0_i32_0 : i32, i32
  }
  func.func @transform_7(%arg0: i32) -> (i32, i32, i32) {
    %c0_i32 = arith.constant 0 : i32
    %c0_i32_0 = arith.constant 0 : i32
    %c0_i32_1 = arith.constant 0 : i32
    return %arg0, %c0_i32, %c0_i32_0 : i32, i32, i32
  }
}

</mosaic_0001>

<bundles_post_ra>
// kernel: tpu_custom_call.1
= control target key start
LH: loop header
LB: loop body
LE: loop exit
PB: predicated region body
PF: predicated region fallthrough
CT: control target
= control target key end

     0   :  { %12 = vsyncpa [#allocation3], 0  ;;  %s2849_s0 = inlined_call_operand.vmem [shape: f32[2,4,16], index: 0, kind: input, shape index: {}]   ;;  %s2850_s1 = inlined_call_operand.vmem [shape: bf16[3,16,4], index: 1, kind: input, shape index: {}]   ;;  %s2851_s2 = inlined_call_operand.vmem [shape: f32[16,1], index: 2, kind: input, shape index: {}]   ;;  %s2852_s3 = inlined_call_operand.vmem [shape: f32[16,1], index: 3, kind: input, shape index: {}]   ;;  %s2853_s4 = inlined_call_operand.vmem [shape: bf16[3,4,8], index: 4, kind: input, shape index: {}]   ;;  %s2854_s5 = inlined_call_operand.vmem [shape: f32[4,1], index: 5, kind: input, shape index: {}]   ;;  %s2855_s6 = inlined_call_operand.vmem [shape: f32[4,1], index: 6, kind: input, shape index: {}]   ;;  %s2856_s7 = inlined_call_operand.hbm [shape: f32[2,4,16], index: 7, kind: output, shape index: {}]  }
   0x1   :  { %14 = vsyncpa [#allocation3 + $0x1], 0  ;;  %s2261_s24 = smov 0   ;;  %s2263_s25 = smov 0  }
   0x2   :  { %s2265_s26 = smov 0   ;;  %s2267_s27 = smov 0  }
   0x3 LB: > { %s2282_s28 = sadd.s32 4294967295, %s2211_s27   ;;  %s1940_s29 = sadd.s32 4294967294, %s2211_s27   ;;  %s2211_s27 = sphi %s2267_s27, %s2862_s27   ;;  %s2207_s26 = sphi %s2265_s26, %s2861_s26   ;;  %s2203_s25 = sphi %s2263_s25, %s2860_s25   ;;  %s2199_s24 = sphi %s2261_s24, %s2859_s24  }
   0x4   : > { %s2286_s30 = sadd.s32 1, %s2211_s27   ;;  %s179_s8 = sadd.s32 1, %s2207_s26 }
   0x5   : > { %s176_s9 = ssub.s32 %s2211_s27, %s2286_s30  ;;  %p189_p0 = scmp.ne.s32.totalorder %s2207_s26, %s2203_s25 }
   0x6   : > { %p177_p1 = scmp.eq.s32.totalorder %s176_s9, 0  ;;  %p190_p2 = scmp.eq.s32.totalorder %s2282_s28, 1 }
   0x7   : > { %p195_p3 = scmp.ne.s32.totalorder %s2203_s25, %s2199_s24  ;;  %p196_p4 = scmp.eq.s32.totalorder %s1940_s29, 1 }
   0x8   : > { %s2297_s10 = scalar_select %p177_p1, %s2207_s26, %s179_s8  }
   0x9   : > { %p2299_p5 = por %p190_p2, %p189_p0  ;;  %p2303_p6 = por %p196_p4, %p195_p3 }
   0xa   : > { %p1943_p7 = scmp.ge.s32.totalorder %s2211_s27, 1  ;;  %p239_p8 = scmp.lt.s32.totalorder %s2211_s27, 3 }
   0xc   : > { %p240_p9 = pnand %p1943_p7, %p239_p8 }
   0xd   : > { %p270_p10 = scmp.lt.s32.totalorder (!%p240_p9), %s2282_s28, 1  ;;  %s2213_s18 = smov (!%p240_p9), 16  }
   0xe   : > { %243 = sbr.rel (%p240_p9) target bundleno = 1862 (0x746), region = 48  ;;  %s2218_s8 = smov (!%p240_p9), 113  }
   0xf   : > { %s2219_s9 = smov (!%p240_p9), 127   ;;  %s267_s20 = sand.u32 (!%p240_p9), 1, %s2203_s25  }
  0x10   : > { %s1944_s21 = sshll.u32 (!%p240_p9), %s267_s20, 2  ;;  %s1972_s22 = sshll.u32 (!%p240_p9), %s2282_s28, 6 }
  0x11   : > { %s269_s23 = scalar_lea.vmem (!%p240_p9), [#allocation2], %s1944_s21 }
  0x12   : > { %s1881_s29 = sshll.u32 (!%p240_p9), %s269_s23, 4  ;;  %s1882_s29 = int_to_ptr.vmem [resolvable:$true] %s1881_s29 }
  0x13   : > { %s271_s13 = scalar_select %p270_p10, %s2282_s28, 1  ;;  %vm324_vm0 = vcmask 1041408   ;;  %v2214_v2 = vmov 0.0   ;;  %vm2215_vm1 = vmmov 0   ;;  %v2071_v4 = vld [vmem:[%s2850_s1 + $0x8] sm:$0xff]   ;;  %vm320_vm2 = vcmask 31744  }
  0x14   : > { %1987 = vmatprep.subr.bf16.mxu0 %v2214_v2  ;;  %1989 = vmatprep.mubr.msk.bf16.mxu0 %vm2215_vm1, %v2214_v2  ;;  %vm292_vm3 = vcmask 1047680   ;;  %v2216_v7 = vmov 1966171168   ;;  %v276_v9 = vlaneseq  ;;  %v816_v14 = vld [vmem:[%s2851_s2 + $0x8] sm:$0xff]  ;;  %v2217_v17 = vmov 0   ;;  %v2072_v55 = vld [vmem:[%s2850_s1] sm:$0xff]  }
  0x15   : > { %s1945_s14 = sshll.u32 %s271_s13, 2  ;;  %1993 = vmatprep.subr.bf16.mxu1 %v2214_v2  ;;  %1995 = vmatprep.mubr.msk.bf16.mxu1 %vm2215_vm1, %v2214_v2  ;;  %v493_v8 = vunpack.c.l.s4 %v2216_v7  ;;  %v1062_v15 = vld [vmem:[%s2852_s3 + $0x8] sm:$0xff]  ;;  %v868_v28 = vcombine.high %v816_v14, %v816_v14  ;;  %v2073_v59 = vld [vmem:[%s2850_s1 + $0x10] sm:$0xff]   ;;  %vm605_vm6 = vcmask 122880   ;;  %vm1461_vm7 = vcmask 1041409   ;;  %s1868_s13 = scalar_lea.sflag [#allocation3], %s267_s20 }
  0x16   : > { %s2314_s17 = scalar_lea.vmem %s2849_s0, %s1945_s14  ;;  %v2334_v11 = vshrl.u32 %v276_v9, 7  ;;  %2069 = vset.pattern.permute.xlu1 %v2217_v17  ;;  %2070 = vset.pattern.permute.xlu0 %v2217_v17  ;;  %v1114_v22 = vcombine.high %v1062_v15, %v1062_v15  ;;  %v277_v46 = vand.u32 127, %v276_v9  ;;  %vm1464_vm8 = vcmask 1042434   ;;  %s2151_s14 = scalar_lea.vmem %s1882_s29, 64 }
  0x17   : > { %v275_v0 = vld [vmem:[%s2314_s17] sm:$0xf]  ;;  %v494_v10 = vunpack.c.0.s8 %v493_v8  ;;  %vm1467_vm9 = vcmask 1043459   ;;  %vm1470_vm10 = vcmask 1044484   ;;  %vm1473_vm11 = vcmask 1045509   ;;  %p2152_p11 = scmp.ne.s32.totalorder %s1882_s29, %s2151_s14  ;;  %s2220_s28 = smov [#allocation2]  }
  0x18   : > { %293 = vrot.lane.b32.xlu0 %v275_v0, %s2213_s18  ;;  %v314_v1 = vpack.c.bf16 %v275_v0, %v275_v0  ;;  %v282_v47 = vand.u32 15, %v277_v46  ;;  %vm1476_vm12 = vcmask 1046534   ;;  %vm1479_vm13 = vcmask 1047559   ;;  %s2155_s15 = sshll.u32 %s2220_s28, 4  ;;  %s2156_s15 = int_to_ptr.vmem [resolvable:$false] %s2155_s15 }
  0x19   : > { %v2337_v12 = vsub.s32 %v494_v10, %v2334_v11  ;;  %vm1486_vm14 = vcmask 1043456   ;;  %vm1482_vm15 = vcmask 64512   ;;  %p2153_p12 = pnand %p2152_p11, %p2299_p5  ;;  %s2157_s16 = scalar_lea.vmem %s2156_s15, 128 }
  0x1a   : > { %v326_v3 = vsel %vm324_vm0, %v314_v1, 0  ;;  %v2366_v48 = vadd.s32 4294967295, %v282_v47  ;;  %v2369_v49 = vadd.s32 1, %v282_v47  ;;  %p2158_p0 = scmp.lt.s32.totalorder %s1882_s29, %s2156_s15  ;;  %p2159_p1 = scmp.lt.s32.totalorder %s2157_s16, %s2151_s14 }
  0x1b   : > { %1988 = vmatpush3.bf16.msra.mxu0 %v326_v3  ;;  %v875_v18 = vrot.slane %v816_v14, %v2337_v12  ;;  %v1121_v19 = vrot.slane %v1062_v15, %v2337_v12  ;;  %v1128_v26 = vrot.slane %v1114_v22, %v2337_v12  ;;  %v882_v31 = vrot.slane %v868_v28, %v2337_v12  ;;  %p2154_p13 = pneg %p2153_p12 }
  0x1c   : > { %1999 = vmatprep.subr.bf16.mxu0 %v2214_v2  ;;  %vm300_vm4 = vcmp.ge.s32.totalorder %v2366_v48, 0  ;;  %vm426_vm5 = vcmp.lt.s32.totalorder %v2369_v49, 16  ;;  %v1967_v49 = vld [vmem:[%s2853_s4 + $0x4] sm:$0x3]  ;;  %p2160_p2 = por %p2159_p1, %p2158_p0 }
  0x1d   : > { %v883_v20 = vcombine.high %v875_v18, %v875_v18  ;;  %v1137_v23 = vrot.slane %v1121_v19, %v2337_v12  ;;  %v891_v24 = vrot.slane %v875_v18, %v2337_v12  ;;  %v2355_v29 = vrot.slane %v1128_v26, %v2337_v12 }
  0x1e   : > { %1990 = vmatmul.mubr.msk.bf16.vlgmr.msra.gmra.mxu0 %vm320_vm2, %v2071_v4  ;;  %v898_v32 = vrot.slane %v882_v31, %v2337_v12  ;;  %v884_v33 = vcombine.high %v882_v31, %v882_v31  ;;  %v1129_v37 = vcombine.high %v1121_v19, %v1121_v19  ;;  %v1130_v40 = vcombine.high %v1128_v26, %v1128_v26  ;;  %p2161_p3 = pnand %p2160_p2, %p2154_p13 }
  0x1f   : > { %2001 = vmatprep.mubr.msk.bf16.mxu0 %vm2215_vm1, %v2214_v2  ;;  %v905_v21 = vrot.slane %v883_v20, %v2337_v12  ;;  %v1159_v25 = vcombine.high %v1137_v23, %v1137_v23  ;;  %v913_v27 = vcombine.high %v891_v24, %v891_v24 }
  0x20   : > { %v912_v34 = vrot.slane %v884_v33, %v2337_v12  ;;  %v914_v35 = vcombine.high %v898_v32, %v898_v32  ;;  %v1151_v38 = vrot.slane %v1129_v37, %v2337_v12  ;;  %v2363_v41 = vrot.slane %v1130_v40, %v2337_v12 }
  0x21   : > { %v915_v30 = vcombine.high %v905_v21, %v905_v21 }
  0x22   : > { %v916_v36 = vcombine.high %v912_v34, %v912_v34  ;;  %v1161_v39 = vcombine.high %v1151_v38, %v1151_v38 }
  0x8a   : > { %v294_v5 = vpop.permute.xlu0 %293 }
  0x8b   : > { %v295_v6 = vsel %vm292_vm3, %v294_v5, %v275_v0 }
  0x8c   : > { %296 = vrot.lane.b32.xlu0 %v295_v6, %s2213_s18 }
  0x90   : > { %990 = vperm.xlu0 %2070, %v905_v21  }
  0x94   : > { %1244 = vperm.xlu0 %2070, %v1159_v25  }
  0x98   : > { %1260 = vperm.xlu0 %2070, %v2355_v29  }
  0xde   : > { %v362_v42 = vpop.f32.mrf.mxu0 }
  0xe0   : > { %v1991_v43 = vpop.f32.mrf.mxu0 }
  0xe2   : > { %v365_v44 = vpop.f32.mrf.mxu0 }
  0xe4   : > { %v1992_v45 = vpop.f32.mrf.mxu0 }
  0xfe   : > { %v297_v13 = vpop.permute.xlu0 %296 }
  0xff   : > { %v298_v16 = vsel %vm292_vm3, %v297_v13, %v275_v0 }
 0x100   : > { %306 = vrot.lane.b32.xlu1 %v298_v16, %s2218_s8 }
 0x104   : > { %430 = vrot.lane.b32.xlu1 %v298_v16, %s2219_s9 }
 0x108   : > { %982 = vperm.xlu1 %2069, %v891_v24  }
 0x10c   : > { %998 = vperm.xlu1 %2069, %v913_v27  }
 0x110   : > { %1006 = vperm.xlu1 %2069, %v915_v30  }
 0x114   : > { %1014 = vperm.xlu1 %2069, %v898_v32  }
 0x118   : > { %1022 = vperm.xlu1 %2069, %v912_v34  }
 0x11c   : > { %1030 = vperm.xlu1 %2069, %v914_v35  }
 0x120   : > { %1038 = vperm.xlu1 %2069, %v916_v36  }
 0x124   : > { %1228 = vperm.xlu1 %2069, %v1137_v23  }
 0x128   : > { %1236 = vperm.xlu1 %2069, %v1151_v38  }
 0x12c   : > { %1252 = vperm.xlu1 %2069, %v1161_v39  }
 0x130   : > { %1268 = vperm.xlu1 %2069, %v2363_v41  }
 0x172   : > { %v307_v50 = vpop.permute.xlu1 %306 }
 0x173   : > { %v309_v51 = vsel %vm300_vm4, %v307_v50, 0.0 }
 0x174   : > { %v310_v52 = vpack.c.bf16 %v309_v51, %v309_v51 }
 0x176   : > { %v431_v53 = vpop.permute.xlu1 %430  ;;  %v378_v54 = vsel %vm324_vm0, %v310_v52, 0 }
 0x177   : > { %v433_v56 = vsel %vm426_vm5, %v431_v53, 0.0  ;;  %1994 = vmatpush3.bf16.msra.mxu1 %v378_v54 }
 0x178   : > { %v434_v57 = vpack.c.bf16 %v433_v56, %v433_v56  ;;  %2005 = vmatprep.subr.bf16.mxu1 %v2214_v2 }
 0x17a   : > { %v444_v58 = vsel %vm324_vm0, %v434_v57, 0  ;;  %1996 = vmatmul.mubr.msk.bf16.vlgmr.msra.gmra.mxu1 %vm320_vm2, %v2072_v55  ;;  %v1162_v57 = vcombine.high %v2363_v41, %v2363_v41  ;;  %vm1865_vm0 = vcmask 125952  }
 0x17b   : > { %2000 = vmatpush3.bf16.msra.mxu0 %v444_v58  ;;  %2007 = vmatprep.mubr.msk.bf16.mxu1 %vm2215_vm1, %v2214_v2  ;;  %v1160_v58 = vcombine.high %v2355_v29, %v2355_v29  ;;  %v2506_v29 = vpop.permute.xlu0 %990 }
 0x17c   : > { %2011 = vmatprep.subr.bf16.mxu0 %v2214_v2 }
 0x17e   : > { %2002 = vmatmul.mubr.msk.bf16.vlgmr.msra.gmra.mxu0 %vm320_vm2, %v2073_v59 }
 0x17f   : > { %2013 = vmatprep.mubr.msk.bf16.mxu0 %vm2215_vm1, %v2214_v2 }
 0x183   : > { %v2488_v59 = vpop.permute.xlu1 %982 }
 0x23a   : > { %v414_v60 = vpop.f32.mrf.mxu1 }
 0x23b   : > { %v415_v62 = vadd.f32 %v414_v60, %v362_v42  ;;  %v2490_v60 = vpop.permute.xlu1 %998 }
 0x23c   : > { %v1997_v61 = vpop.f32.mrf.mxu1 }
 0x23e   : > { %v417_v63 = vpop.f32.mrf.mxu1  ;;  %v480_v0 = vpop.f32.mrf.mxu0 }
 0x23f   : > { %v487_v1 = vadd.f32 %v480_v0, %v415_v62  ;;  %v418_v5 = vadd.f32 %v417_v63, %v365_v44  ;;  %v2492_v61 = vpop.permute.xlu1 %1006 }
 0x240   : > { %v1998_v3 = vpop.f32.mrf.mxu1  ;;  %v2003_v4 = vpop.f32.mrf.mxu0 }
 0x241   : > { %v491_v6 = vcombine.high %v487_v1, %v487_v1  ;;  %v498_v7 = vrot.slane %v487_v1, %v2337_v12 }
 0x242   : > { %v483_v8 = vpop.f32.mrf.mxu0 }
 0x243   : > { %v506_v9 = vcombine.high %v498_v7, %v498_v7  ;;  %v2394_v10 = vrot.slane %v498_v7, %v2337_v12  ;;  %v488_v13 = vadd.f32 %v483_v8, %v418_v5  ;;  %v505_v15 = vrot.slane %v491_v6, %v2337_v12  ;;  %v2494_v62 = vpop.permute.xlu1 %1014  ;;  %v2510_v5 = vpop.permute.xlu0 %1244 }
 0x244   : > { %v2004_v14 = vpop.f32.mrf.mxu0 }
 0x245   : > { %v547_v16 = vrot.slane %v488_v13, %v2337_v12  ;;  %v606_v17 = vsel %vm605_vm6, %v2394_v10, 0.0  ;;  %v2401_v18 = vrot.slane %v506_v9, %v2337_v12  ;;  %v2405_v19 = vcombine.high %v2394_v10, %v2394_v10 }
 0x246   : > { %607 = vadd.xlane.f32.xlu1 %v606_v17  ;;  %v2415_v23 = vrot.slane %v505_v15, %v2337_v12  ;;  %v507_v24 = vcombine.high %v505_v15, %v505_v15  ;;  %v540_v27 = vcombine.high %v488_v13, %v488_v13 }
 0x247   : > { %v2408_v20 = vrot.slane %v547_v16, %v2337_v12  ;;  %v609_v21 = vsel %vm605_vm6, %v2401_v18, 0.0  ;;  %v612_v22 = vsel %vm605_vm6, %v2405_v19, 0.0  ;;  %v2421_v26 = vcombine.high %v2401_v18, %v2401_v18  ;;  %v2496_v63 = vpop.permute.xlu1 %1022  ;;  %v2514_v7 = vpop.permute.xlu0 %1260 }
 0x248   : > { %610 = vadd.xlane.f32.xlu0 %v609_v21  ;;  %v555_v28 = vcombine.high %v547_v16, %v547_v16  ;;  %v618_v30 = vsel %vm605_vm6, %v2415_v23, 0.0  ;;  %v2427_v31 = vcombine.high %v2415_v23, %v2415_v23  ;;  %v2432_v33 = vrot.slane %v507_v24, %v2337_v12 }
 0x249   : > { %v630_v25 = vsel %vm605_vm6, %v2408_v20, 0.0  ;;  %v615_v32 = vsel %vm605_vm6, %v2421_v26, 0.0  ;;  %v554_v34 = vrot.slane %v540_v27, %v2337_v12  ;;  %v2444_v38 = vcombine.high %v2408_v20, %v2408_v20 }
 0x24a   : > { %613 = vadd.xlane.f32.xlu1 %v612_v22  ;;  %v624_v35 = vsel %vm605_vm6, %v2427_v31, 0.0  ;;  %v2438_v36 = vrot.slane %v555_v28, %v2337_v12  ;;  %v621_v37 = vsel %vm605_vm6, %v2432_v33, 0.0  ;;  %v2455_v43 = vcombine.high %v2432_v33, %v2432_v33 }
 0x24b   : > { %v2449_v40 = vrot.slane %v554_v34, %v2337_v12  ;;  %v636_v42 = vsel %vm605_vm6, %v2444_v38, 0.0  ;;  %v556_v46 = vcombine.high %v554_v34, %v554_v34  ;;  %v2498_v0 = vpop.permute.xlu1 %1030 }
 0x24c   : > { %631 = vadd.xlane.f32.xlu0 %v630_v25  ;;  %v633_v39 = vsel %vm605_vm6, %v2438_v36, 0.0  ;;  %v627_v47 = vsel %vm605_vm6, %v2455_v43, 0.0  ;;  %v2467_v50 = vcombine.high %v2438_v36, %v2438_v36 }
 0x24d   : > { %v642_v44 = vsel %vm605_vm6, %v2449_v40, 0.0  ;;  %v2461_v45 = vcombine.high %v2449_v40, %v2449_v40  ;;  %v2474_v53 = vrot.slane %v556_v46, %v2337_v12 }
 0x24e   : > { %619 = vadd.xlane.f32.xlu1 %v618_v30  ;;  %v639_v52 = vsel %vm605_vm6, %v2467_v50, 0.0 }
 0x24f   : > { %v648_v51 = vsel %vm605_vm6, %v2461_v45, 0.0  ;;  %v645_v54 = vsel %vm605_vm6, %v2474_v53, 0.0  ;;  %v2480_v55 = vcombine.high %v2474_v53, %v2474_v53  ;;  %v2500_v1 = vpop.permute.xlu1 %1038 }
 0x250   : > { %616 = vadd.xlane.f32.xlu0 %v615_v32 }
 0x251   : > { %v651_v56 = vsel %vm605_vm6, %v2480_v55, 0.0 }
 0x252   : > { %625 = vadd.xlane.f32.xlu1 %v624_v35 }
 0x253   : > { %v2502_v41 = vpop.permute.xlu1 %1228 }
 0x254   : > { %622 = vadd.xlane.f32.xlu0 %v621_v37 }
 0x256   : > { %634 = vadd.xlane.f32.xlu1 %v633_v39 }
 0x257   : > { %v2504_v3 = vpop.permute.xlu1 %1236 }
 0x258   : > { %637 = vadd.xlane.f32.xlu0 %v636_v42 }
 0x25a   : > { %643 = vadd.xlane.f32.xlu1 %v642_v44 }
 0x25b   : > { %v2508_v4 = vpop.permute.xlu1 %1252 }
 0x25c   : > { %628 = vadd.xlane.f32.xlu0 %v627_v47 }
 0x25e   : > { %649 = vadd.xlane.f32.xlu1 %v648_v51 }
 0x25f   : > { %v2512_v6 = vpop.permute.xlu1 %1268 }
 0x260   : > { %640 = vadd.xlane.f32.xlu0 %v639_v52 }
 0x264   : > { %646 = vadd.xlane.f32.xlu0 %v645_v54 }
 0x268   : > { %652 = vadd.xlane.f32.xlu0 %v651_v56 }
 0x26f   : > { %1284 = vperm.xlu1 %2069, %v1162_v57  }
 0x27e   : > { %1276 = vperm.xlu0 %2070, %v1160_v58  }
 0x2cf   : > { %v608_v8 = vpop.xlane.xlu1 %607 }
 0x2d0   : > { %v655_v9 = vmul.f32 0.0625, %v608_v8 }
 0x2d1   : > { %v611_v14 = vpop.xlane.xlu0 %610 }
 0x2d2   : > { %v2517_v13 = vsub.f32 %v2394_v10, %v655_v9  ;;  %v656_v15 = vmul.f32 0.0625, %v611_v14 }
 0x2d3   : > { %v614_v16 = vpop.xlane.xlu1 %613 }
 0x2d4   : > { %v657_v17 = vmul.f32 0.0625, %v614_v16  ;;  %v687_v21 = vmul.f32 %v2517_v13, %v2517_v13  ;;  %v2522_v22 = vsub.f32 %v2401_v18, %v656_v15 }
 0x2d5   : > { %v632_v25 = vpop.xlane.xlu0 %631 }
 0x2d6   : > { %v2525_v24 = vsub.f32 %v2405_v19, %v657_v17  ;;  %v703_v27 = vsel %vm605_vm6, %v687_v21, 0.0  ;;  %v663_v28 = vmul.f32 0.0625, %v632_v25  ;;  %v688_v10 = vmul.f32 %v2522_v22, %v2522_v22 }
 0x2d7   : > { %v620_v30 = vpop.xlane.xlu1 %619  ;;  %704 = vadd.xlane.f32.xlu0 %v703_v27 }
 0x2d8   : > { %v659_v32 = vmul.f32 0.0625, %v620_v30  ;;  %v689_v34 = vmul.f32 %v2525_v24, %v2525_v24  ;;  %v706_v35 = vsel %vm605_vm6, %v688_v10, 0.0  ;;  %v2534_v18 = vsub.f32 %v2408_v20, %v663_v28 }
 0x2d9   : > { %v617_v37 = vpop.xlane.xlu0 %616  ;;  %707 = vadd.xlane.f32.xlu1 %v706_v35 }
 0x2da   : > { %v2537_v19 = vsub.f32 %v2415_v23, %v659_v32  ;;  %v709_v39 = vsel %vm605_vm6, %v689_v34, 0.0  ;;  %v658_v42 = vmul.f32 0.0625, %v617_v37  ;;  %v695_v54 = vmul.f32 %v2534_v18, %v2534_v18 }
 0x2db   : > { %v626_v44 = vpop.xlane.xlu1 %625  ;;  %710 = vadd.xlane.f32.xlu0 %v709_v39 }
 0x2dc   : > { %v661_v46 = vmul.f32 0.0625, %v626_v44  ;;  %v691_v47 = vmul.f32 %v2537_v19, %v2537_v19  ;;  %v2543_v51 = vsub.f32 %v2421_v26, %v658_v42  ;;  %v727_v15 = vsel %vm605_vm6, %v695_v54, 0.0 }
 0x2dd   : > { %v623_v52 = vpop.xlane.xlu0 %622 }
 0x2de   : > { %v2546_v20 = vsub.f32 %v2427_v31, %v661_v46  ;;  %v715_v23 = vsel %vm605_vm6, %v691_v47, 0.0  ;;  %v660_v56 = vmul.f32 0.0625, %v623_v52  ;;  %v690_v58 = vmul.f32 %v2543_v51, %v2543_v51 }
 0x2df   : > { %v635_v57 = vpop.xlane.xlu1 %634  ;;  %716 = vadd.xlane.f32.xlu1 %v715_v23 }
 0x2e0   : > { %v664_v8 = vmul.f32 0.0625, %v635_v57  ;;  %v2554_v9 = vsub.f32 %v2432_v33, %v660_v56  ;;  %v712_v26 = vsel %vm605_vm6, %v690_v58, 0.0  ;;  %v693_v16 = vmul.f32 %v2546_v20, %v2546_v20 }
 0x2e1   : > { %v638_v14 = vpop.xlane.xlu0 %637  ;;  %713 = vadd.xlane.f32.xlu0 %v712_v26 }
 0x2e2   : > { %v2558_v31 = vsub.f32 %v2438_v36, %v664_v8  ;;  %v665_v17 = vmul.f32 0.0625, %v638_v14  ;;  %v692_v25 = vmul.f32 %v2554_v9, %v2554_v9  ;;  %v721_v32 = vsel %vm605_vm6, %v693_v16, 0.0 }
 0x2e3   : > { %v644_v21 = vpop.xlane.xlu1 %643  ;;  %728 = vadd.xlane.f32.xlu1 %v727_v15 }
 0x2e4   : > { %v667_v33 = vmul.f32 0.0625, %v644_v21  ;;  %v2566_v27 = vsub.f32 %v2444_v38, %v665_v17  ;;  %v718_v36 = vsel %vm605_vm6, %v692_v25, 0.0  ;;  %v696_v28 = vmul.f32 %v2558_v31, %v2558_v31 }
 0x2e5   : > { %v629_v10 = vpop.xlane.xlu0 %628  ;;  %719 = vadd.xlane.f32.xlu0 %v718_v36  ;;  %v815_v36 = vld [vmem:[%s2851_s2] sm:$0xff] }
 0x2e6   : > { %v2572_v30 = vsub.f32 %v2449_v40, %v667_v33  ;;  %v697_v35 = vmul.f32 %v2566_v27, %v2566_v27  ;;  %v730_v38 = vsel %vm605_vm6, %v696_v28, 0.0  ;;  %v662_v57 = vmul.f32 0.0625, %v629_v10 }
 0x2e7   : > { %722 = vadd.xlane.f32.xlu1 %v721_v32  ;;  %v650_v34 = vpop.xlane.xlu1 %649  ;;  %v819_v28 = vcombine.high %v815_v36, %v815_v36 }
 0x2e8   : > { %v669_v37 = vmul.f32 0.0625, %v650_v34  ;;  %v733_v40 = vsel %vm605_vm6, %v697_v35, 0.0  ;;  %v699_v44 = vmul.f32 %v2572_v30, %v2572_v30  ;;  %v2600_v16 = vsub.f32 %v2455_v43, %v662_v57 }
 0x2e9   : > { %v641_v42 = vpop.xlane.xlu0 %640  ;;  %731 = vadd.xlane.f32.xlu0 %v730_v38  ;;  %v826_v43 = vrot.slane %v815_v36, %v2337_v12 }
 0x2ea   : > { %v2579_v39 = vsub.f32 %v2461_v45, %v669_v37  ;;  %v666_v46 = vmul.f32 0.0625, %v641_v42  ;;  %v739_v23 = vsel %vm605_vm6, %v699_v44, 0.0  ;;  %v694_v33 = vmul.f32 %v2600_v16, %v2600_v16 }
 0x2eb   : > { %734 = vadd.xlane.f32.xlu1 %v733_v40  ;;  %v842_v10 = vrot.slane %v826_v43, %v2337_v12  ;;  %v834_v32 = vcombine.high %v826_v43, %v826_v43  ;;  %v833_v37 = vrot.slane %v819_v28, %v2337_v12  ;;  %v1061_v40 = vld [vmem:[%s2852_s3] sm:$0xff]  ;;  %v2632_v43 = vpop.permute.xlu1 %1284 }
 0x2ec   : > { %v2585_v47 = vsub.f32 %v2467_v50, %v666_v46  ;;  %v701_v54 = vmul.f32 %v2579_v39, %v2579_v39  ;;  %v1072_v46 = vrot.slane %v1061_v40, %v2337_v12 }
 0x2ed   : > { %v647_v52 = vpop.xlane.xlu0 %646  ;;  %v864_v34 = vcombine.high %v842_v10, %v842_v10  ;;  %v856_v35 = vrot.slane %v834_v32, %v2337_v12  ;;  %v835_v42 = vcombine.high %v833_v37, %v833_v37 }
 0x2ee   : > { %v668_v45 = vmul.f32 0.0625, %v647_v52  ;;  %v698_v56 = vmul.f32 %v2585_v47, %v2585_v47  ;;  %v745_v26 = vsel %vm605_vm6, %v701_v54, 0.0  ;;  %v1065_v54 = vcombine.high %v1061_v40, %v1061_v40 }
 0x2ef   : > { %740 = vadd.xlane.f32.xlu1 %v739_v23  ;;  %v866_v38 = vcombine.high %v856_v35, %v856_v35  ;;  %v863_v44 = vrot.slane %v835_v42, %v2337_v12  ;;  %v1080_v23 = vcombine.high %v1072_v46, %v1072_v46 }
 0x2f0   : > { %v2593_v58 = vsub.f32 %v2474_v53, %v668_v45  ;;  %v736_v8 = vsel %vm605_vm6, %v698_v56, 0.0  ;;  %v849_v45 = vrot.slane %v833_v37, %v2337_v12  ;;  %v1079_v57 = vrot.slane %v1065_v54, %v2337_v12 }
 0x2f1   : > { %737 = vadd.xlane.f32.xlu0 %v736_v8  ;;  %v653_v50 = vpop.xlane.xlu0 %652  ;;  %v867_v52 = vcombine.high %v863_v44, %v863_v44  ;;  %v1102_v56 = vrot.slane %v1080_v23, %v2337_v12 }
 0x2f2   : > { %v670_v14 = vmul.f32 0.0625, %v653_v50  ;;  %v700_v15 = vmul.f32 %v2593_v58, %v2593_v58  ;;  %v865_v8 = vcombine.high %v849_v45, %v849_v45 }
 0x2f3   : > { %746 = vadd.xlane.f32.xlu1 %v745_v26  ;;  %v1112_v50 = vcombine.high %v1102_v56, %v1102_v56  ;;  %v1081_v26 = vcombine.high %v1079_v57, %v1079_v57 }
 0x2f4   : > { %v2603_v17 = vsub.f32 %v2480_v55, %v670_v14  ;;  %v742_v53 = vsel %vm605_vm6, %v700_v15, 0.0  ;;  %v724_v55 = vsel %vm605_vm6, %v694_v33, 0.0  ;;  %v1088_v14 = vrot.slane %v1072_v46, %v2337_v12 }
 0x2f5   : > { %743 = vadd.xlane.f32.xlu0 %v742_v53  ;;  %v1109_v15 = vrot.slane %v1081_v26, %v2337_v12 }
 0x2f6   : > { %v702_v21 = vmul.f32 %v2603_v17, %v2603_v17  ;;  %v1110_v53 = vcombine.high %v1088_v14, %v1088_v14 }
 0x2f8   : > { %v748_v25 = vsel %vm605_vm6, %v702_v21, 0.0  ;;  %v1113_v21 = vcombine.high %v1109_v15, %v1109_v15 }
 0x2f9   : > { %749 = vadd.xlane.f32.xlu0 %v748_v25  ;;  %v1095_v25 = vrot.slane %v1079_v57, %v2337_v12  ;;  %v2630_v36 = vpop.permute.xlu0 %1276 }
 0x2fb   : > { %v1111_v33 = vcombine.high %v1095_v25, %v1095_v25 }
 0x2fd   : > { %725 = vadd.xlane.f32.xlu0 %v724_v55 }
 0x304   : > { %918 = vperm.xlu1 %2069, %v842_v10  }
 0x308   : > { %934 = vperm.xlu1 %2069, %v864_v34  }
 0x30c   : > { %942 = vperm.xlu1 %2069, %v866_v38  }
 0x310   : > { %958 = vperm.xlu1 %2069, %v863_v44  }
 0x313   : > { %926 = vperm.xlu0 %2070, %v856_v35  }
 0x314   : > { %974 = vperm.xlu1 %2069, %v867_v52  }
 0x317   : > { %950 = vperm.xlu0 %2070, %v849_v45  }
 0x318   : > { %1172 = vperm.xlu1 %2069, %v1102_v56  }
 0x31b   : > { %966 = vperm.xlu0 %2070, %v865_v8   ;;  %v2647_v8 = vsub.s32 0, %v2334_v11 }
 0x31c   : > { %1188 = vperm.xlu1 %2069, %v1112_v50  }
 0x31d   : > { %v1234_v11 = vrot.slane %v2502_v41, %v2647_v8  ;;  %v1004_v41 = vrot.slane %v2490_v60, %v2647_v8  ;;  %v1020_v60 = vrot.slane %v2494_v62, %v2647_v8 }
 0x31f   : > { %1164 = vperm.xlu0 %2070, %v1088_v14  }
 0x320   : > { %1204 = vperm.xlu1 %2069, %v1109_v15  }
 0x323   : > { %1180 = vperm.xlu0 %2070, %v1110_v53  }
 0x324   : > { %1220 = vperm.xlu1 %2069, %v1113_v21  }
 0x327   : > { %1196 = vperm.xlu0 %2070, %v1095_v25  }
 0x32b   : > { %1212 = vperm.xlu0 %2070, %v1111_v33   ;;  %v988_v33 = vrot.slane %v2488_v59, %v2647_v8 }
 0x360   : > { %v705_v55 = vpop.xlane.xlu0 %704 }
 0x362   : > { %v2634_v28 = vpop.xlane.xlu1 %707 }
 0x364   : > { %v2636_v10 = vpop.xlane.xlu0 %710 }
 0x368   : > { %v2638_v32 = vpop.xlane.xlu1 %716 }
 0x36a   : > { %v2640_v34 = vpop.xlane.xlu0 %713 }
 0x36c   : > { %v729_v35 = vpop.xlane.xlu1 %728 }
 0x36d   : > { %v759_v37 = vmul.f32 0.0625, %v729_v35 }
 0x36e   : > { %v2642_v42 = vpop.xlane.xlu0 %719 }
 0x36f   : > { %v775_v38 = vadd.f32 1e-05, %v759_v37 }
 0x370   : > { %v2644_v40 = vpop.xlane.xlu1 %722 }
 0x371   : > { %2078 = vrsqrt.f32 %v775_v38 }
 0x372   : > { %v732_v44 = vpop.xlane.xlu0 %731 }
 0x373   : > { %v760_v46 = vmul.f32 0.0625, %v732_v44 }
 0x374   : > { %v735_v52 = vpop.xlane.xlu1 %734 }
 0x375   : > { %v761_v23 = vmul.f32 0.0625, %v735_v52  ;;  %v776_v54 = vadd.f32 1e-05, %v760_v46 }
 0x377   : > { %v777_v45 = vadd.f32 1e-05, %v761_v23  ;;  %2080 = vrsqrt.f32 %v776_v54 }
 0x378   : > { %v741_v56 = vpop.xlane.xlu1 %740 }
 0x379   : > { %2082 = vrsqrt.f32 %v777_v45  ;;  %v763_v57 = vmul.f32 0.0625, %v741_v56 }
 0x37a   : > { %v738_v26 = vpop.xlane.xlu0 %737 }
 0x37b   : > { %v779_v50 = vadd.f32 1e-05, %v763_v57  ;;  %v762_v14 = vmul.f32 0.0625, %v738_v26 }
 0x37c   : > { %v747_v15 = vpop.xlane.xlu1 %746 }
 0x37d   : > { %2084 = vrsqrt.f32 %v779_v50  ;;  %v765_v53 = vmul.f32 0.0625, %v747_v15  ;;  %v778_v25 = vadd.f32 1e-05, %v762_v14 }
 0x37e   : > { %v2079_v21 = vpop.eup %2078  ;;  %v744_v38 = vpop.xlane.xlu0 %743 }
 0x37f   : > { %v807_v35 = vmul.f32 %v2079_v21, %v2534_v18  ;;  %v781_v37 = vadd.f32 1e-05, %v765_v53  ;;  %2086 = vrsqrt.f32 %v778_v25  ;;  %v764_v44 = vmul.f32 0.0625, %v744_v38 }
 0x380   : > { %v2654_v23 = vpop.permute.xlu1 %918  ;;  %v996_v18 = vrot.slane %v2506_v29, %v2647_v8  ;;  %v1242_v53 = vrot.slane %v2504_v3, %v2647_v8 }
 0x381   : > { %v1053_v46 = vmul.f32 %v988_v33, %v807_v35  ;;  %2088 = vrsqrt.f32 %v781_v37  ;;  %v780_v52 = vadd.f32 1e-05, %v764_v44  ;;  %v1250_v33 = vrot.slane %v2510_v5, %v2647_v8 }
 0x382   : > { %v750_v45 = vpop.xlane.xlu0 %749 }
 0x383   : > { %v1299_v54 = vadd.f32 %v1234_v11, %v1053_v46  ;;  %2090 = vrsqrt.f32 %v780_v52  ;;  %v766_v56 = vmul.f32 0.0625, %v750_v45  ;;  %v1266_v46 = vrot.slane %v2514_v7, %v2647_v8 }
 0x384   : > { %v2081_v57 = vpop.eup %2080  ;;  %v2664_v25 = vpop.permute.xlu1 %934  ;;  %v752_v52 = vmul.f32 0.0625, %v2634_v28 }
 0x385   : > { %v1956_v59 = vmul.f32 -1.442695, %v1299_v54  ;;  %v808_v26 = vmul.f32 %v2081_v57, %v2558_v31  ;;  %v782_v14 = vadd.f32 1e-05, %v766_v56  ;;  %v751_v31 = vmul.f32 0.0625, %v705_v55 }
 0x386   : > { %v2083_v50 = vpop.eup %2082  ;;  %v2671_v44 = vpop.xlane.xlu0 %725  ;;  %v1012_v55 = vrot.slane %v2492_v61, %v2647_v8  ;;  %v1036_v57 = vrot.slane %v2498_v0, %v2647_v8  ;;  %v1282_v61 = vrot.slane %v2630_v36, %v2647_v8 }
 0x387   : > { %2092 = vpow2.f32 %v1956_v59  ;;  %v809_v15 = vmul.f32 %v2083_v50, %v2566_v27  ;;  %v1054_v21 = vmul.f32 %v996_v18, %v808_v26  ;;  %v767_v56 = vadd.f32 1e-05, %v751_v31 }
 0x388   : > { %2094 = vrsqrt.f32 %v782_v14  ;;  %v1258_v50 = vrot.slane %v2508_v4, %v2647_v8  ;;  %v753_v18 = vmul.f32 0.0625, %v2636_v10  ;;  %v768_v14 = vadd.f32 1e-05, %v752_v52 }
 0x389   : > { %v1055_v29 = vmul.f32 %v1004_v41, %v809_v15  ;;  %v1300_v37 = vadd.f32 %v1242_v53, %v1054_v21  ;;  %v755_v41 = vmul.f32 0.0625, %v2638_v32  ;;  %v1274_v4 = vrot.slane %v2512_v6, %v2647_v8 }
 0x38a   : > { %v2085_v35 = vpop.eup %2084  ;;  %v754_v32 = vmul.f32 0.0625, %v2640_v34  ;;  %v1044_v6 = vrot.slane %v2500_v1, %v2647_v8  ;;  %v1290_v34 = vrot.slane %v2632_v43, %v2647_v8 }
 0x38b   : > { %v1301_v38 = vadd.f32 %v1250_v33, %v1055_v29  ;;  %v811_v27 = vmul.f32 %v2085_v35, %v2572_v30  ;;  %v1957_v3 = vmul.f32 -1.442695, %v1300_v37  ;;  %v2679_v30 = vpop.permute.xlu1 %942  ;;  %v769_v29 = vadd.f32 1e-05, %v753_v18 }
 0x38c   : > { %v2087_v11 = vpop.eup %2086  ;;  %v770_v52 = vadd.f32 1e-05, %v754_v32  ;;  %v940_v32 = vrot.slane %v2664_v25, %v2647_v8 }
 0x38d   : > { %v1958_v5 = vmul.f32 -1.442695, %v1301_v38  ;;  %v1057_v54 = vmul.f32 %v1020_v60, %v811_v27  ;;  %2096 = vpow2.f32 %v1957_v3  ;;  %v810_v62 = vmul.f32 %v2087_v11, %v2585_v47 }
 0x38e   : > { %v2089_v45 = vpop.eup %2088  ;;  %v2684_v28 = vpop.permute.xlu0 %926  ;;  %v771_v60 = vadd.f32 1e-05, %v755_v41 }
 0x38f   : > { %2098 = vpow2.f32 %v1958_v5  ;;  %v1303_v59 = vadd.f32 %v1266_v46, %v1057_v54  ;;  %v813_v7 = vmul.f32 %v2089_v45, %v2579_v39  ;;  %v1056_v47 = vmul.f32 %v1012_v55, %v810_v62  ;;  %v2700_v37 = vpop.permute.xlu1 %958 }
 0x390   : > { %v2091_v26 = vpop.eup %2090  ;;  %v1028_v39 = vrot.slane %v2496_v63, %v2647_v8  ;;  %2100 = vrsqrt.f32 %v767_v56  ;;  %v758_v55 = vmul.f32 0.0625, %v2671_v44 }
 0x391   : > { %v1960_v0 = vmul.f32 -1.442695, %v1303_v59  ;;  %v1059_v15 = vmul.f32 %v1036_v57, %v813_v7  ;;  %v1302_v53 = vadd.f32 %v1258_v50, %v1056_v47  ;;  %v812_v21 = vmul.f32 %v2091_v26, %v2593_v58 }
 0x392   : > { %v2697_v10 = vpop.permute.xlu0 %950  ;;  %v757_v58 = vmul.f32 0.0625, %v2644_v40  ;;  %v756_v40 = vmul.f32 0.0625, %v2642_v42 }
 0x393   : > { %2102 = vpow2.f32 %v1960_v0  ;;  %v1305_v36 = vadd.f32 %v1282_v61, %v1059_v15  ;;  %v1959_v35 = vmul.f32 -1.442695, %v1302_v53  ;;  %v1058_v31 = vmul.f32 %v1028_v39, %v812_v21 }
 0x394   : > { %v2093_v33 = vpop.eup %2092  ;;  %2104 = vrsqrt.f32 %v768_v14  ;;  %v773_v45 = vadd.f32 1e-05, %v757_v58  ;;  %v772_v7 = vadd.f32 1e-05, %v756_v40  ;;  %v774_v61 = vadd.f32 1e-05, %v758_v55 }
 0x395   : > { %v2095_v63 = vpop.eup %2094  ;;  %v1962_v38 = vmul.f32 -1.442695, %v1305_v36  ;;  %2106 = vpow2.f32 %v1959_v35  ;;  %v1304_v27 = vadd.f32 %v1274_v4, %v1058_v31  ;;  %v1331_v46 = vadd.f32 1.0, %v2093_v33 }
 0x396   : > { %v814_v3 = vmul.f32 %v2095_v63, %v2603_v17  ;;  %v2708_v11 = vpop.permute.xlu0 %966  ;;  %v2712_v17 = vpop.permute.xlu1 %974  ;;  %v924_v0 = vrot.slane %v2654_v23, %v2647_v8  ;;  %v932_v4 = vrot.slane %v2684_v28, %v2647_v8 }
 0x397   : > { %2108 = vpow2.f32 %v1962_v38  ;;  %v1961_v5 = vmul.f32 -1.442695, %v1304_v27  ;;  %v956_v38 = vrot.slane %v2697_v10, %v2647_v8  ;;  %v948_v10 = vrot.slane %v2679_v30, %v2647_v8 }
 0x398   : > { %2110 = vrsqrt.f32 %v769_v29  ;;  %v1060_v54 = vmul.f32 %v1044_v6, %v814_v3 }
 0x399   : > { %2112 = vrsqrt.f32 %v771_v60 }
 0x39a   : > { %2114 = vpow2.f32 %v1961_v5  ;;  %v1306_v1 = vadd.f32 %v1290_v34, %v1060_v54  ;;  %v2097_v56 = vpop.eup %2096  ;;  %v1165_v43 = vpop.permute.xlu0 %1164 }
 0x39b   : > { %2116 = vrcp.f32 %v1331_v46  ;;  %v1332_v59 = vadd.f32 1.0, %v2097_v56  ;;  %v1173_v47 = vpop.permute.xlu1 %1172  ;;  %v1170_v36 = vrot.slane %v1165_v43, %v2647_v8 }
 0x39c   : > { %v2099_v62 = vpop.eup %2098  ;;  %2118 = vrsqrt.f32 %v770_v52  ;;  %v1963_v57 = vmul.f32 -1.442695, %v1306_v1  ;;  %v1178_v58 = vrot.slane %v1173_v47, %v2647_v8 }
 0x39d   : > { %2120 = vrsqrt.f32 %v773_v45  ;;  %v1333_v50 = vadd.f32 1.0, %v2099_v62  ;;  %v2101_v42 = vpop.eup %2100 }
 0x39e   : > { %2122 = vpow2.f32 %v1963_v57  ;;  %v1181_v44 = vpop.permute.xlu0 %1180  ;;  %v799_v21 = vmul.f32 %v2101_v42, %v2517_v13 }
 0x39f   : > { %2124 = vrcp.f32 %v1332_v59  ;;  %v1189_v35 = vpop.permute.xlu1 %1188  ;;  %v1186_v27 = vrot.slane %v1181_v44, %v2647_v8 }
 0x3a0   : > { %v2103_v18 = vpop.eup %2102  ;;  %2126 = vrcp.f32 %v1333_v50  ;;  %v1045_v63 = vmul.f32 %v924_v0, %v799_v21  ;;  %v972_v50 = vrot.slane %v2708_v11, %v2647_v8  ;;  %v1194_v42 = vrot.slane %v1189_v35, %v2647_v8 }
 0x3a1   : > { %2128 = vrsqrt.f32 %v772_v7  ;;  %v1335_v26 = vadd.f32 1.0, %v2103_v18  ;;  %v2105_v14 = vpop.eup %2104 }
 0x3a2   : > { %2130 = vrsqrt.f32 %v774_v61  ;;  %v2107_v41 = vpop.eup %2106  ;;  %v1197_v31 = vpop.permute.xlu0 %1196  ;;  %v800_v60 = vmul.f32 %v2105_v14, %v2522_v22  ;;  %v1291_v34 = vadd.f32 %v1170_v36, %v1045_v63 }
 0x3a3   : > { %2132 = vrcp.f32 %v1335_v26  ;;  %v1334_v39 = vadd.f32 1.0, %v2107_v41  ;;  %v1202_v22 = vrot.slane %v1197_v31, %v2647_v8  ;;  %v1205_v55 = vpop.permute.xlu1 %1204 }
 0x3a4   : > { %v2109_v15 = vpop.eup %2108  ;;  %v1046_v3 = vmul.f32 %v932_v4, %v800_v60 }
 0x3a5   : > { %v2111_v53 = vpop.eup %2110  ;;  %v1337_v33 = vadd.f32 1.0, %v2109_v15  ;;  %2134 = vrcp.f32 %v1334_v39 }
 0x3a6   : > { %v2113_v29 = vpop.eup %2112  ;;  %v801_v28 = vmul.f32 %v2111_v53, %v2525_v24  ;;  %v1292_v40 = vadd.f32 %v1178_v58, %v1046_v3  ;;  %v1213_v62 = vpop.permute.xlu0 %1212 }
 0x3a7   : > { %v2115_v23 = vpop.eup %2114  ;;  %2136 = vrcp.f32 %v1337_v33  ;;  %v803_v5 = vmul.f32 %v2113_v29, %v2537_v19  ;;  %v1218_v41 = vrot.slane %v1213_v62, %v2647_v8  ;;  %v1210_v33 = vrot.slane %v1205_v55, %v2647_v8 }
 0x3a8   : > { %v2117_v13 = vpop.eup %2116  ;;  %v1336_v6 = vadd.f32 1.0, %v2115_v23  ;;  %v1047_v52 = vmul.f32 %v940_v32, %v801_v28  ;;  %v1221_v32 = vpop.permute.xlu1 %1220 }
 0x3a9   : > { %v2119_v25 = vpop.eup %2118  ;;  %v1355_v24 = vmul.f32 %v2117_v13, %v1291_v34  ;;  %v1049_v1 = vmul.f32 %v956_v38, %v803_v5 }
 0x3aa   : > { %v2121_v46 = vpop.eup %2120  ;;  %2138 = vrcp.f32 %v1336_v6  ;;  %v1293_v56 = vadd.f32 %v1186_v27, %v1047_v52  ;;  %v802_v59 = vmul.f32 %v2119_v25, %v2543_v51 }
 0x3ab   : > { %v2123_v54 = vpop.eup %2122  ;;  %v805_v7 = vmul.f32 %v2121_v46, %v2546_v20  ;;  %v1295_v30 = vadd.f32 %v1202_v22, %v1049_v1  ;;  %v1436_v14 = vpack.c.bf16 %v1355_v24, %v1355_v24  ;;  %v964_v20 = vrot.slane %v2700_v37, %v2647_v8 }
 0x3ac   : > { %v2125_v45 = vpop.eup %2124  ;;  %v1338_v43 = vadd.f32 1.0, %v2123_v54  ;;  %v1048_v51 = vmul.f32 %v948_v10, %v802_v59 }
 0x3ad   : > { %v2127_v57 = vpop.eup %2126  ;;  %v1356_v19 = vmul.f32 %v2125_v45, %v1292_v40  ;;  %v1051_v53 = vmul.f32 %v972_v50, %v805_v7  ;;  %v1452_v23 = vunpack.c.l.b16 %v1436_v14 }
 0x3ae   : > { %v2129_v61 = vpop.eup %2128  ;;  %v1357_v18 = vmul.f32 %v2127_v57, %v1293_v56  ;;  %2140 = vrcp.f32 %v1338_v43  ;;  %v1294_v36 = vadd.f32 %v1194_v42, %v1048_v51 }
 0x3af   : > { %v2131_v47 = vpop.eup %2130  ;;  %v1437_v44 = vpack.c.bf16 %v1356_v19, %v1356_v19  ;;  %v1372_v26 = vcombine.low %v1355_v24, %v1356_v19  ;;  %v804_v11 = vmul.f32 %v2129_v61, %v2554_v9  ;;  %v1297_v60 = vadd.f32 %v1218_v41, %v1051_v53 }
 0x3b0   : > { %v2133_v0 = vpop.eup %2132  ;;  %v1438_v15 = vpack.c.bf16 %v1357_v18, %v1357_v18  ;;  %v806_v4 = vmul.f32 %v2131_v47, %v2600_v16  ;;  %v980_v9 = vrot.slane %v2712_v17, %v2647_v8  ;;  %v1226_v16 = vrot.slane %v1221_v32, %v2647_v8 }
 0x3b1   : > { %v1453_v39 = vunpack.c.l.b16 %v1437_v44  ;;  %v1359_v21 = vmul.f32 %v2133_v0, %v1295_v30  ;;  %v1050_v58 = vmul.f32 %v964_v20, %v804_v11  ;;  %v1382_v40 = vrot.slane %v1372_v26, %v2337_v12 }
 0x3b2   : > { %v1454_v29 = vunpack.c.l.b16 %v1438_v15  ;;  %v2135_v35 = vpop.eup %2134  ;;  %v1052_v52 = vmul.f32 %v980_v9, %v806_v4 }
 0x3b3   : > { %v1460_v31 = vrot.slane %v1453_v39, 7  ;;  %v1440_v63 = vpack.c.bf16 %v1359_v21, %v1359_v21  ;;  %v1358_v13 = vmul.f32 %v2135_v35, %v1294_v36  ;;  %v1296_v25 = vadd.f32 %v1210_v33, %v1050_v58  ;;  %v1964_v33 = vld [vmem:[%s2853_s4 + $0x2] sm:$0x3] }
 0x3b4   : > { %v2137_v37 = vpop.eup %2136  ;;  %v1463_v28 = vrot.slane %v1454_v29, 6  ;;  %v1298_v45 = vadd.f32 %v1226_v16, %v1052_v52 }
 0x3b5   : > { %v1462_v38 = vsel %vm1461_vm7, %v1460_v31, %v1452_v23  ;;  %v1361_v6 = vmul.f32 %v2137_v37, %v1297_v60  ;;  %v1439_v27 = vpack.c.bf16 %v1358_v13, %v1358_v13  ;;  %v1373_v3 = vcombine.low %v1357_v18, %v1358_v13  ;;  %v1363_v13 = vld [vmem:[%s2853_s4] sm:$0x3] }
 0x3b6   : > { %v1465_v34 = vsel %vm1464_vm8, %v1463_v28, %v1462_v38  ;;  %v1456_v5 = vunpack.c.l.b16 %v1440_v63 }
 0x3b7   : > { %v2139_v46 = vpop.eup %2138  ;;  %v1442_v22 = vpack.c.bf16 %v1361_v6, %v1361_v6  ;;  %v1455_v54 = vunpack.c.l.b16 %v1439_v27  ;;  %v1389_v17 = vrot.slane %v1373_v3, %v2337_v12 }
 0x3b8   : > { %v1360_v24 = vmul.f32 %v2139_v46, %v1296_v25  ;;  %v1469_v62 = vrot.slane %v1456_v5, 4 }
 0x3b9   : > { %v1466_v10 = vrot.slane %v1455_v54, 5  ;;  %v1404_v56 = vcombine.low %v1382_v40, %v1389_v17  ;;  %v1458_v57 = vunpack.c.l.b16 %v1442_v22 }
 0x3ba   : > { %v1441_v1 = vpack.c.bf16 %v1360_v24, %v1360_v24  ;;  %v1374_v55 = vcombine.low %v1359_v21, %v1360_v24 }
 0x3bb   : > { %v2141_v43 = vpop.eup %2140  ;;  %v1468_v7 = vsel %vm1467_vm9, %v1466_v10, %v1465_v34  ;;  %v1475_v30 = vrot.slane %v1458_v57, 2  ;;  %v1412_v15 = vrot.slane %v1404_v56, %v2337_v12 }
 0x3bc   : > { %v1457_v59 = vunpack.c.l.b16 %v1441_v1  ;;  %v1362_v19 = vmul.f32 %v2141_v43, %v1298_v45  ;;  %v1471_v50 = vsel %vm1470_vm10, %v1469_v62, %v1468_v7  ;;  %v1396_v44 = vrot.slane %v1374_v55, %v2337_v12  ;;  %v1969_v62 = vld.sshfl [vmem:[%s2854_s5] sm:$0x33 pattern:$0x75316420] }
 0x3bd   : > { %v1720_v57 = vcombine.high %v1969_v62, %v1969_v62 }
 0x3be   : > { %v1472_v61 = vrot.slane %v1457_v59, 3  ;;  %v1443_v42 = vpack.c.bf16 %v1362_v19, %v1362_v19  ;;  %v1375_v18 = vcombine.low %v1361_v6, %v1362_v19  ;;  %v1727_v59 = vrot.slane %v1969_v62, %v2337_v12 }
 0x3bf   : > { %v1734_v7 = vrot.slane %v1720_v57, %v2337_v12 }
 0x3c0   : > { %v1459_v47 = vunpack.c.l.b16 %v1443_v42  ;;  %v1403_v26 = vrot.slane %v1375_v18, %v2337_v12  ;;  %v1474_v14 = vsel %vm1473_vm11, %v1472_v61, %v1471_v50  ;;  %v1735_v19 = vcombine.high %v1727_v59, %v1727_v59  ;;  %v1970_v50 = vld.sshfl [vmem:[%s2855_s6] sm:$0x33 pattern:$0x75316420] }
 0x3c1   : > { %v1477_v41 = vsel %vm1476_vm12, %v1475_v30, %v1474_v14  ;;  %v1736_v61 = vcombine.high %v1734_v7, %v1734_v7  ;;  %v1782_v42 = vcombine.high %v1970_v50, %v1970_v50  ;;  %v1789_v30 = vrot.slane %v1970_v50, %v2337_v12 }
 0x3c2   : > { %v1478_v0 = vrot.slane %v1459_v47, 1  ;;  %v1405_v51 = vcombine.low %v1396_v44, %v1403_v26 }
 0x3c3   : > { %v1796_v18 = vrot.slane %v1782_v42, %v2337_v12 }
 0x3c4   : > { %v1480_v20 = vsel %vm1479_vm13, %v1478_v0, %v1477_v41  ;;  %v1419_v11 = vrot.slane %v1405_v51, %v2337_v12 }
 0x3c5   : > { %v1481_v39 = vpack.c.b16 %v1480_v20, %v1480_v20 }
 0x3c6   : > { %v1420_v53 = vcombine.low %v1412_v15, %v1419_v11 }
 0x3c7   : > { %v1488_v21 = vsel %vm1486_vm14, %v1481_v39, 0 }
 0x3c8   : > { %2006 = vmatpush3.bf16.msra.mxu1 %v1488_v21  ;;  %1422 = vrot.lane.b32.xlu0 %v1420_v53, %s2213_s18 }
 0x3c9   : > { %2017 = vmatprep.subr.bf16.mxu1 %v2214_v2 }
 0x3cb   : > { %2008 = vmatmul.mubr.msk.bf16.vlgmr.msra.gmra.mxu1 %vm1482_vm15, %v1964_v33 }
 0x3cc   : > { %2019 = vmatprep.mubr.msk.bf16.mxu1 %vm2215_vm1, %v2214_v2 }
 0x43a   : > { %v1423_v4 = vpop.permute.xlu0 %1422 }
 0x43b   : > { %v1424_v36 = vsel %vm292_vm3, %v1423_v4, %v1420_v53 }
 0x43c   : > { %1425 = vrot.lane.b32.xlu1 %v1424_v36, %s2213_s18 }
 0x48b   : > { %v1524_v48 = vpop.f32.mrf.mxu1 }
 0x48d   : > { %v2009_v28 = vpop.f32.mrf.mxu1 }
 0x48f   : > { %v1527_v9 = vpop.f32.mrf.mxu1 }
 0x491   : > { %v2010_v38 = vpop.f32.mrf.mxu1 }
 0x4ae   : > { %v1426_v29 = vpop.permute.xlu1 %1425 }
 0x4af   : > { %v1427_v32 = vsel %vm292_vm3, %v1426_v29, %v1420_v53 }
 0x4b0   : > { %1578 = vrot.lane.b32.xlu1 %v1427_v32, %s2219_s9  ;;  %1429 = vrot.lane.b32.xlu0 %v1427_v32, %s2218_s8  ;;  %s1879_s8 = scalar_lea.hbm %s2856_s7, %s1972_s22 }
 0x522   : > { %v1579_v35 = vpop.permute.xlu1 %1578  ;;  %v1430_v31 = vpop.permute.xlu0 %1429 }
 0x523   : > { %v1581_v23 = vsel %vm426_vm5, %v1579_v35, 0.0  ;;  %v1432_v63 = vsel %vm300_vm4, %v1430_v31, 0.0 }
 0x524   : > { %v1582_v60 = vpack.c.bf16 %v1581_v23, %v1581_v23  ;;  %v1433_v37 = vpack.c.bf16 %v1432_v63, %v1432_v63  ;;  %v1798_v23 = vcombine.high %v1796_v18, %v1796_v18  ;;  %v1797_v63 = vcombine.high %v1789_v30, %v1789_v30 }
 0x526   : > { %v1587_v58 = vsel %vm1486_vm14, %v1582_v60, 0  ;;  %v1534_v2 = vsel %vm1486_vm14, %v1433_v37, 0 }
 0x527   : > { %2012 = vmatpush3.bf16.msra.mxu0 %v1534_v2  ;;  %2018 = vmatpush3.bf16.msra.mxu1 %v1587_v58 }
 0x52a   : > { %2014 = vmatmul.mubr.msk.bf16.vlgmr.msra.gmra.mxu0 %vm1482_vm15, %v1363_v13  ;;  %2020 = vmatmul.mubr.msk.bf16.vlgmr.msra.gmra.mxu1 %vm1482_vm15, %v1967_v49 }
 0x5ea   : > { %v1570_v16 = vpop.f32.mrf.mxu0  ;;  %v1623_v6 = vpop.f32.mrf.mxu1 }
 0x5eb   : > { %v1571_v27 = vadd.f32 %v1570_v16, %v1524_v48 }
 0x5ec   : > { %v2015_v25 = vpop.f32.mrf.mxu0  ;;  %v2021_v3 = vpop.f32.mrf.mxu1 }
 0x5ed   : > { %v1629_v34 = vadd.f32 %v1623_v6, %v1571_v27 }
 0x5ee   : > { %v1573_v46 = vpop.f32.mrf.mxu0  ;;  %v1626_v52 = vpop.f32.mrf.mxu1 }
 0x5ef   : > { %v1637_v5 = vrot.slane %v1629_v34, %v2337_v12 }
 0x5f0   : > { %v2016_v22 = vpop.f32.mrf.mxu0  ;;  %v2022_v54 = vpop.f32.mrf.mxu1 }
 0x5f1   : > { %v1638_v40 = vcombine.high %v1637_v5, %v1637_v5  ;;  %v1645_v24 = vrot.slane %v1637_v5, %v2337_v12 }
 0x5f3   : > { %v1659_v17 = vsel %vm605_vm6, %v1645_v24, 0.0  ;;  %v1652_v45 = vrot.slane %v1638_v40, %v2337_v12  ;;  %v1653_v10 = vcombine.high %v1645_v24, %v1645_v24 }
 0x5f4   : > { %1660 = vadd.xlane.f32.xlu0 %v1659_v17 }
 0x5f5   : > { %v1662_v1 = vsel %vm605_vm6, %v1652_v45, 0.0  ;;  %v1665_v55 = vsel %vm605_vm6, %v1653_v10, 0.0  ;;  %v1654_v56 = vcombine.high %v1652_v45, %v1652_v45 }
 0x5f6   : > { %1663 = vadd.xlane.f32.xlu1 %v1662_v1 }
 0x5f7   : > { %v1668_v43 = vsel %vm605_vm6, %v1654_v56, 0.0 }
 0x5f8   : > { %1666 = vadd.xlane.f32.xlu0 %v1665_v55 }
 0x5fc   : > { %1669 = vadd.xlane.f32.xlu0 %v1668_v43 }
 0x607   : > { %1738 = vperm.xlu1 %2069, %v1727_v59  }
 0x60b   : > { %1754 = vperm.xlu1 %2069, %v1735_v19  }
 0x60f   : > { %1762 = vperm.xlu1 %2069, %v1736_v61  }
 0x612   : > { %1746 = vperm.xlu0 %2070, %v1734_v7  }
 0x613   : > { %1808 = vperm.xlu1 %2069, %v1796_v18  }
 0x616   : > { %1800 = vperm.xlu0 %2070, %v1789_v30  }
 0x67d   : > { %v1661_v47 = vpop.xlane.xlu0 %1660 }
 0x67e   : > { %v1671_v44 = vmul.f32 0.0625, %v1661_v47 }
 0x67f   : > { %v1664_v26 = vpop.xlane.xlu1 %1663 }
 0x680   : > { %v1675_v14 = vsub.f32 %v1645_v24, %v1671_v44  ;;  %v1672_v41 = vmul.f32 0.0625, %v1664_v26 }
 0x681   : > { %v1667_v0 = vpop.xlane.xlu0 %1666 }
 0x682   : > { %v1676_v51 = vsub.f32 %v1652_v45, %v1672_v41  ;;  %v1673_v20 = vmul.f32 0.0625, %v1667_v0  ;;  %v1679_v15 = vmul.f32 %v1675_v14, %v1675_v14 }
 0x683   : > { %v1739_v60 = vpop.permute.xlu1 %1738 }
 0x684   : > { %v1677_v11 = vsub.f32 %v1653_v10, %v1673_v20  ;;  %v1683_v39 = vsel %vm605_vm6, %v1679_v15, 0.0  ;;  %v1680_v53 = vmul.f32 %v1676_v51, %v1676_v51  ;;  %v1744_v45 = vrot.slane %v1739_v60, %v2647_v8 }
 0x685   : > { %1684 = vadd.xlane.f32.xlu1 %v1683_v39  ;;  %v1670_v21 = vpop.xlane.xlu0 %1669  ;;  %v2150_v39 = vld [vmem:[%s2314_s17] sm:$0xf] }
 0x686   : > { %v1674_v4 = vmul.f32 0.0625, %v1670_v21  ;;  %v1686_v36 = vsel %vm605_vm6, %v1680_v53, 0.0  ;;  %v1681_v33 = vmul.f32 %v1677_v11, %v1677_v11 }
 0x687   : > { %1687 = vadd.xlane.f32.xlu0 %v1686_v36  ;;  %v1755_v37 = vpop.permute.xlu1 %1754 }
 0x688   : > { %v1678_v29 = vsub.f32 %v1654_v56, %v1674_v4  ;;  %v1689_v32 = vsel %vm605_vm6, %v1681_v33, 0.0  ;;  %v1760_v55 = vrot.slane %v1755_v37, %v2647_v8 }
 0x689   : > { %1690 = vadd.xlane.f32.xlu1 %v1689_v32 }
 0x68a   : > { %v1682_v35 = vmul.f32 %v1678_v29, %v1678_v29 }
 0x68b   : > { %v1763_v58 = vpop.permute.xlu1 %1762 }
 0x68c   : > { %v1692_v31 = vsel %vm605_vm6, %v1682_v35, 0.0  ;;  %v1768_v57 = vrot.slane %v1763_v58, %v2647_v8 }
 0x68d   : > { %1693 = vadd.xlane.f32.xlu0 %v1692_v31  ;;  %v1747_v2 = vpop.permute.xlu0 %1746 }
 0x68e   : > { %v1752_v54 = vrot.slane %v1747_v2, %v2647_v8 }
 0x68f   : > { %v1809_v13 = vpop.permute.xlu1 %1808 }
 0x690   : > { %v1814_v56 = vrot.slane %v1809_v13, %v2647_v8 }
 0x691   : > { %v1801_v49 = vpop.permute.xlu0 %1800 }
 0x692   : > { %v1806_v7 = vrot.slane %v1801_v49, %v2647_v8 }
 0x69a   : > { %1824 = vperm.xlu1 %2069, %v1798_v23  }
 0x6a3   : > { %1816 = vperm.xlu0 %2070, %v1797_v63  }
 0x70e   : > { %v1685_v48 = vpop.xlane.xlu1 %1684 }
 0x70f   : > { %v1695_v28 = vmul.f32 0.0625, %v1685_v48 }
 0x710   : > { %v1688_v9 = vpop.xlane.xlu0 %1687 }
 0x711   : > { %v1699_v38 = vadd.f32 1e-05, %v1695_v28  ;;  %v1696_v16 = vmul.f32 0.0625, %v1688_v9 }
 0x712   : > { %v1691_v6 = vpop.xlane.xlu1 %1690 }
 0x713   : > { %2142 = vrsqrt.f32 %v1699_v38  ;;  %v1700_v27 = vadd.f32 1e-05, %v1696_v16  ;;  %v1697_v25 = vmul.f32 0.0625, %v1691_v6 }
 0x715   : > { %2144 = vrsqrt.f32 %v1700_v27  ;;  %v1701_v3 = vadd.f32 1e-05, %v1697_v25 }
 0x716   : > { %v1694_v34 = vpop.xlane.xlu0 %1693  ;;  %v1825_v59 = vpop.permute.xlu1 %1824 }
 0x717   : > { %2146 = vrsqrt.f32 %v1701_v3  ;;  %v1698_v46 = vmul.f32 0.0625, %v1694_v34  ;;  %v1830_v18 = vrot.slane %v1825_v59, %v2647_v8 }
 0x719   : > { %v1702_v52 = vadd.f32 1e-05, %v1698_v46 }
 0x71b   : > { %2148 = vrsqrt.f32 %v1702_v52 }
 0x71e   : > { %v1817_v19 = vpop.permute.xlu0 %1816 }
 0x71f   : > { %v1822_v44 = vrot.slane %v1817_v19, %v2647_v8 }
 0x720   : > { %v2143_v5 = vpop.eup %2142 }
 0x721   : > { %v1707_v40 = vmul.f32 %v2143_v5, %v1675_v14 }
 0x722   : > { %v2145_v22 = vpop.eup %2144 }
 0x723   : > { %v1708_v24 = vmul.f32 %v2145_v22, %v1676_v51  ;;  %v1769_v43 = vmul.f32 %v1744_v45, %v1707_v40 }
 0x724   : > { %v2147_v17 = vpop.eup %2146 }
 0x725   : > { %v1709_v10 = vmul.f32 %v2147_v17, %v1677_v11  ;;  %v1770_v1 = vmul.f32 %v1752_v54, %v1708_v24  ;;  %v1831_v47 = vadd.f32 %v1806_v7, %v1769_v43 }
 0x727   : > { %v1771_v61 = vmul.f32 %v1760_v55, %v1709_v10  ;;  %v1832_v42 = vadd.f32 %v1814_v56, %v1770_v1 }
 0x728   : > { %v2149_v62 = vpop.eup %2148 }
 0x729   : > { %v1710_v50 = vmul.f32 %v2149_v62, %v1678_v29  ;;  %v1839_v14 = vcombine.low %v1831_v47, %v1832_v42  ;;  %v1833_v41 = vadd.f32 %v1822_v44, %v1771_v61 }
 0x72b   : > { %v1772_v30 = vmul.f32 %v1768_v57, %v1710_v50  ;;  %v1847_v51 = vrot.slane %v1839_v14, %v2337_v12 }
 0x72d   : > { %v1834_v26 = vadd.f32 %v1830_v18, %v1772_v30 }
 0x72f   : > { %v1840_v0 = vcombine.low %v1833_v41, %v1834_v26 }
 0x731   : > { %v1854_v20 = vrot.slane %v1840_v0, %v2337_v12 }
 0x733   : > { %v1855_v15 = vcombine.low %v1847_v51, %v1854_v20 }
 0x735   : > { %v1862_v11 = vrot.slane %v1855_v15, %v2337_v12 }
 0x737   : > { %v1864_v8 = vadd.f32 %v2150_v39, %v1862_v11 }
 0x739   : > { %1866 = vst.msk [vmem:[%s269_s23] sm:$0xf] %vm1865_vm0, %v1864_v8 }
 0x73a   : > { %2164 = shalt.err (!%p2161_p3)
}
 0x73b   : > { %s2165_s17 = scalar_lea.hbm %s1879_s8, 64  ;;  %s2169_s21 = scalar_lea.hbm %s2856_s7, 128 }
 0x73c   : > { %p2166_p4 = scmp.ne.s32.totalorder %s1879_s8, %s2165_s17  ;;  %p2170_p9 = scmp.lt.s32.totalorder %s1879_s8, %s2856_s7 }
 0x73d   : > { %p2171_p10 = scmp.lt.s32.totalorder %s2169_s21, %s2165_s17 }
 0x73e   : > { %p2167_p7 = pnand %p2166_p4, %p2299_p5 }
 0x73f   : > { %p2172_p11 = por %p2171_p10, %p2170_p9 }
 0x740   : > { %p2168_p8 = pneg %p2167_p7 }
 0x742   : > { %p2173_p12 = pnand %p2172_p11, %p2168_p8 }
 0x744   : > { %2176 = shalt.err (!%p2173_p12)
}
 0x745   : > { %2023 = dma.vmem_to_hbm [thread:$0]  (%p2299_p5), %s1882_s29, 64, %s1879_s8, %s1868_s13  }
 0x746 PF: > { %p2029_p13 = scmp.ge.s32.totalorder %s2211_s27, 2  ;;  %s1893_s18 = sand.u32 1, %s2199_s24  }
 0x747   : > { %s1894_s9 = scalar_lea.sflag [#allocation3], %s1893_s18 }
 0x748   : > { %p2026_p0 = pnand %p2029_p13, %p2303_p6 }
 0x74a   : > { %p2027_p1 = pneg %p2026_p0 }
 0x74c   : > { %2194 = dma.done.wait (%p2027_p1), %s1894_s9, 64  }
 0x74d   : > { %2196 = vsyncadd (%p2027_p1), %s1894_s9, 4294967232  ;;  %p17_p2 = scmp.ge.s32.totalorder %s2286_s30, 4   ;;  %s2859_s24 = smov %s2203_s25 }
 0x74e   : > { %s2860_s25 = smov %s2207_s26  ;;  %s2861_s26 = smov %s2297_s10 }
 0x74f   : > { %s2862_s27 = smov %s2286_s30  ;;  %19 = sbr.rel (!%p17_p2) target bundleno = 3 (0x3), region = 87 }
 0x754   :  { %1899 = vsyncpa [#allocation3], 1 }
 0x755   :  { %1901 = vsyncpa [#allocation3 + $0x1], 1 }

</bundles_post_ra>
